<compile_context>
chip_gen: v5e
topology: v5e:2x2
jax: 0.10.0
libtpu: 0.0.40
codegen_flags: <defaults>
</compile_context>

<pallas_src>
import functools

import jax
import jax.numpy as jnp
from jax.experimental import pallas as pl
from jax.experimental.pallas import tpu as pltpu

NUM_GROUPS = 32
GN_EPS = 1e-6


def _block_kernel(x_ref, gnw_ref, gnb_ref, w_ref, b_ref, mask_ref, o_ref,
                  astack_ref, *, num_groups, eps, hw, W):
    c_in, n = x_ref.shape[1], x_ref.shape[2]
    x = x_ref[0]  # (C_in, N) f32, lane-dense

    # ---- GroupNorm(num_groups, eps) -----------------------------------------
    # Per-channel lane reductions only; group reduce happens on tiny (C,1)/(G,1)
    # vectors so the big slab is never relayouted.
    gsz = c_in // num_groups
    inv = 1.0 / (gsz * hw)                       # hw = true H*W (padding lanes are 0)
    ch_sum = jnp.sum(x, axis=-1, keepdims=True)      # (C,1)
    ch_sq = jnp.sum(x * x, axis=-1, keepdims=True)   # (C,1)
    if gsz == 1:
        mean_c = ch_sum * inv
        var_c = jnp.maximum(ch_sq * inv - mean_c * mean_c, 0.0)
        rstd_c = jax.lax.rsqrt(var_c + eps)
    else:
        g_sum = jnp.sum(ch_sum.reshape(num_groups, gsz), axis=-1, keepdims=True)
        g_sq = jnp.sum(ch_sq.reshape(num_groups, gsz), axis=-1, keepdims=True)
        mean_g = g_sum * inv
        var_g = jnp.maximum(g_sq * inv - mean_g * mean_g, 0.0)
        rstd_g = jax.lax.rsqrt(var_g + eps)
        mean_c = jnp.broadcast_to(mean_g, (num_groups, gsz)).reshape(c_in, 1)
        rstd_c = jnp.broadcast_to(rstd_g, (num_groups, gsz)).reshape(c_in, 1)
    # Single-pass E[x^2]-E[x]^2 (clamped); fine for activation-scale inputs.

    # Fold affine into one scale/shift over the slab.
    scale = rstd_c * gnw_ref[...]                    # (C,1)
    shift = gnb_ref[...] - mean_c * scale            # (C,1)
    a = x * scale + shift

    # ---- SiLU ----------------------------------------------------------------
    a = a * jax.nn.sigmoid(a)

    # ---- Conv2d 3x3, stride 1, pad 1 ------------------------------------------
    # Build the 9 shifted+masked taps with XLU lane rolls, store them (bf16) into
    # the VMEM scratch slab, then one MXU matmul over the stacked taps.
    for ky in range(3):
        for kx in range(3):
            t = ky * 3 + kx
            dy, dx = ky - 1, kx - 1
            off = dy * W + dx                        # tap[p] = a[p + off] (masked)
            if off == 0:
                tap = a                              # center tap: always valid
            else:
                tap = pltpu.roll(a, shift=(-off) % n, axis=1)
                tap = tap * mask_ref[t]              # (1,N) zero-padding mask
            astack_ref[pl.ds(t * c_in, c_in), :] = tap.astype(jnp.bfloat16)

    out = jnp.dot(w_ref[...], astack_ref[...],
                  preferred_element_type=jnp.float32)   # bf16 x bf16 -> f32
    o_ref[0] = (out + b_ref[...]).astype(o_ref.dtype)


def block_forward(x_nchw, params, num_groups=NUM_GROUPS, eps=GN_EPS):
    b, c_in, H, W = x_nchw.shape
    assert c_in % num_groups == 0, "GroupNorm(32) needs channels % 32 == 0"
    c_out = params["conv_w"].shape[0]
    n = H * W
    n_pad = ((n + 127) // 128) * 128                 # lane-dense stores

    # Channels-first slab (reshape only, no transpose vs NCHW); zero-pad lanes.
    x_cn = x_nchw.reshape(b, c_in, n).astype(jnp.float32)
    if n_pad != n:
        x_cn = jnp.pad(x_cn, ((0, 0), (0, 0), (0, n_pad - n)))

    # Conv weight rearranged so column (ky*3+kx)*C_in + c == w[o, c, ky, kx]; bf16.
    w_stack = jnp.transpose(params["conv_w"], (0, 2, 3, 1)) \
                 .reshape(c_out, 9 * c_in).astype(jnp.bfloat16)
    conv_b = params["conv_b"].reshape(c_out, 1).astype(jnp.float32)
    gn_w = params["gn_w"].reshape(c_in, 1).astype(jnp.float32)
    gn_b = params["gn_b"].reshape(c_in, 1).astype(jnp.float32)

    # Per-tap validity masks (zero padding of the 3x3 conv). Padded lanes only
    # ever feed masked taps of valid positions, so correctness is preserved.
    idx = jnp.arange(n_pad)
    ys = idx // W
    xs = idx % W
    masks = []
    for ky in range(3):
        for kx in range(3):
            dy, dx = ky - 1, kx - 1
            valid = ((ys + dy >= 0) & (ys + dy < H) &
                     (xs + dx >= 0) & (xs + dx < W))
            masks.append(valid)
    mask = jnp.stack(masks).astype(jnp.float32).reshape(9, 1, n_pad)

    kernel = functools.partial(_block_kernel, num_groups=num_groups,
                               eps=eps, hw=n, W=W)

    out = pl.pallas_call(
        kernel,
        out_shape=jax.ShapeDtypeStruct((b, c_out, n_pad), jnp.float32),
        grid_spec=pltpu.PrefetchScalarGridSpec(
            num_scalar_prefetch=0,
            grid=(b,),
            in_specs=[
                pl.BlockSpec((1, c_in, n_pad), lambda i: (i, 0, 0)),   # x slab
                pl.BlockSpec((c_in, 1), lambda i: (0, 0)),             # GN weight
                pl.BlockSpec((c_in, 1), lambda i: (0, 0)),             # GN bias
                pl.BlockSpec((c_out, 9 * c_in), lambda i: (0, 0)),     # conv W (bf16)
                pl.BlockSpec((c_out, 1), lambda i: (0, 0)),            # conv bias
                pl.BlockSpec((9, 1, n_pad), lambda i: (0, 0, 0)),      # tap masks
            ],
            out_specs=pl.BlockSpec((1, c_out, n_pad), lambda i: (i, 0, 0)),
            scratch_shapes=[pltpu.VMEM((9 * c_in, n_pad), jnp.bfloat16)],
        ),
        compiler_params=pltpu.CompilerParams(
            dimension_semantics=("parallel",)),      # batch iters independent
    )(x_cn, gn_w, gn_b, w_stack, conv_b, mask)

    if n_pad != n:
        out = out[..., :n]
    return out.reshape(b, c_out, H, W)


def reference_forward(x, params, num_groups=NUM_GROUPS, eps=GN_EPS):
    """Pure-JAX mirror of the PyTorch Block forward (NCHW)."""
    b, c, H, W = x.shape
    g = c // num_groups
    xg = x.reshape(b, num_groups, g, H, W)
    mu = xg.mean(axis=(2, 3, 4), keepdims=True)
    var = ((xg - mu) ** 2).mean(axis=(2, 3, 4), keepdims=True)
    xn = ((xg - mu) / jnp.sqrt(var + eps)).reshape(b, c, H, W)
    xn = xn * params["gn_w"].reshape(1, c, 1, 1) + params["gn_b"].reshape(1, c, 1, 1)
    a = xn * jax.nn.sigmoid(xn)
    out = jax.lax.conv_general_dilated(
        a, params["conv_w"], window_strides=(1, 1), padding=((1, 1), (1, 1)),
        dimension_numbers=("NCHW", "OIHW", "NCHW"),
        precision=jax.lax.Precision.HIGHEST)
    return out + params["conv_b"].reshape(1, -1, 1, 1)


def init_params(key, c_in, c_out):
    ks = jax.random.split(key, 4)
    fan_in = 9 * c_in
    return {
        "conv_w": jax.random.normal(ks[0], (c_out, c_in, 3, 3), jnp.float32)
                  / (fan_in ** 0.5),
        "conv_b": jax.random.normal(ks[1], (c_out,), jnp.float32) * 0.1,
        "gn_w": 1.0 + 0.1 * jax.random.normal(ks[2], (c_in,), jnp.float32),
        "gn_b": 0.1 * jax.random.normal(ks[3], (c_in,), jnp.float32),
    }


if __name__ == "__main__":
    key = jax.random.PRNGKey(0)
    kx, kp = jax.random.split(key)

    # GroupNorm(num_groups=32) requires channels % 32 == 0, so the smallest
    # consistent example uses 32 input channels.
    B, C_IN, C_OUT, H, W = 2, 32, 64, 16, 16
    x = jax.random.normal(kx, (B, C_IN, H, W), jnp.float32)
    params = init_params(kp, C_IN, C_OUT)

    out = jax.block_until_ready(block_forward(x, params))
    ref = jax.block_until_ready(reference_forward(x, params))

    assert out.shape == ref.shape == (B, C_OUT, H, W)
    max_err = float(jnp.max(jnp.abs(out - ref)))
    # bf16 MXU operands (f32 accumulate) vs f32-HIGHEST reference -> ~1e-2 tolerance.
    assert jnp.allclose(out, ref, atol=3e-2, rtol=3e-2), max_err

    print("KERNEL_OK")
</pallas_src>

<mosaic_0001>
module attributes {stable_mosaic.version = 11 : i64} {
  func.func @_block_kernel(%arg0: i32, %arg1: memref<1x32x256xf32, #tpu.memory_space<vmem>>, %arg2: memref<32x1xf32, #tpu.memory_space<vmem>>, %arg3: memref<32x1xf32, #tpu.memory_space<vmem>>, %arg4: memref<64x288xbf16, #tpu.memory_space<vmem>>, %arg5: memref<64x1xf32, #tpu.memory_space<vmem>>, %arg6: memref<9x1x256xf32, #tpu.memory_space<vmem>>, %arg7: memref<1x64x256xf32, #tpu.memory_space<vmem>>, %arg8: memref<288x256xbf16, #tpu.memory_space<vmem>>) attributes {dimension_semantics = [#tpu.dimension_semantics<parallel>], iteration_bounds = array<i64: 2>, scalar_prefetch = 0 : i64, scratch_operands = 1 : i64, tpu.core_type = #tpu.core_type<tc>, window_params = [{transform_indices = @transform_0, window_bounds = array<i64: 1, 32, 256>}, {pipeline_mode = #tpu.pipeline_mode<synchronous>, transform_indices = @transform_1, window_bounds = array<i64: 32, 1>}, {pipeline_mode = #tpu.pipeline_mode<synchronous>, transform_indices = @transform_2, window_bounds = array<i64: 32, 1>}, {pipeline_mode = #tpu.pipeline_mode<synchronous>, transform_indices = @transform_3, window_bounds = array<i64: 64, 288>}, {pipeline_mode = #tpu.pipeline_mode<synchronous>, transform_indices = @transform_4, window_bounds = array<i64: 64, 1>}, {pipeline_mode = #tpu.pipeline_mode<synchronous>, transform_indices = @transform_5, window_bounds = array<i64: 9, 1, 256>}, {transform_indices = @transform_6, window_bounds = array<i64: 1, 64, 256>}]} {
    %c0 = arith.constant 0 : index
    %c0_0 = arith.constant 0 : index
    %c0_1 = arith.constant 0 : index
    %0 = vector.load %arg1[%c0, %c0_0, %c0_1] : memref<1x32x256xf32, #tpu.memory_space<vmem>>, vector<1x32x256xf32>
    %1 = vector.shape_cast %0 : vector<1x32x256xf32> to vector<32x256xf32>
    %cst = arith.constant dense<0.000000e+00> : vector<32xf32>
    %2 = vector.multi_reduction <add>, %1, %cst [1] : vector<32x256xf32> to vector<32xf32>
    %3 = vector.shape_cast %2 : vector<32xf32> to vector<32x1xf32>
    %4 = arith.mulf %1, %1 : vector<32x256xf32>
    %cst_2 = arith.constant dense<0.000000e+00> : vector<32xf32>
    %5 = vector.multi_reduction <add>, %4, %cst_2 [1] : vector<32x256xf32> to vector<32xf32>
    %6 = vector.shape_cast %5 : vector<32xf32> to vector<32x1xf32>
    %cst_3 = arith.constant 3.906250e-03 : f32
    %7 = vector.broadcast %cst_3 : f32 to vector<32x1xf32>
    %8 = arith.mulf %3, %7 : vector<32x1xf32>
    %cst_4 = arith.constant 3.906250e-03 : f32
    %9 = vector.broadcast %cst_4 : f32 to vector<32x1xf32>
    %10 = arith.mulf %6, %9 : vector<32x1xf32>
    %11 = arith.mulf %8, %8 : vector<32x1xf32>
    %12 = arith.subf %10, %11 : vector<32x1xf32>
    %cst_5 = arith.constant 0.000000e+00 : f32
    %13 = vector.broadcast %cst_5 : f32 to vector<32x1xf32>
    %14 = arith.maximumf %12, %13 : vector<32x1xf32>
    %cst_6 = arith.constant 9.99999997E-7 : f32
    %15 = vector.broadcast %cst_6 : f32 to vector<32x1xf32>
    %16 = arith.addf %14, %15 : vector<32x1xf32>
    %17 = math.rsqrt %16 : vector<32x1xf32>
    %c0_7 = arith.constant 0 : index
    %c0_8 = arith.constant 0 : index
    %18 = vector.load %arg2[%c0_7, %c0_8] : memref<32x1xf32, #tpu.memory_space<vmem>>, vector<32x1xf32>
    %19 = arith.mulf %17, %18 : vector<32x1xf32>
    %c0_9 = arith.constant 0 : index
    %c0_10 = arith.constant 0 : index
    %20 = vector.load %arg3[%c0_9, %c0_10] : memref<32x1xf32, #tpu.memory_space<vmem>>, vector<32x1xf32>
    %21 = arith.mulf %8, %19 : vector<32x1xf32>
    %22 = arith.subf %20, %21 : vector<32x1xf32>
    %23 = vector.broadcast %19 : vector<32x1xf32> to vector<32x256xf32>
    %24 = arith.mulf %1, %23 : vector<32x256xf32>
    %25 = vector.broadcast %22 : vector<32x1xf32> to vector<32x256xf32>
    %26 = arith.addf %24, %25 : vector<32x256xf32>
    %27 = arith.negf %26 : vector<32x256xf32>
    %28 = math.exp %27 : vector<32x256xf32>
    %cst_11 = arith.constant 1.000000e+00 : f32
    %29 = vector.broadcast %cst_11 : f32 to vector<32x256xf32>
    %30 = arith.addf %29, %28 : vector<32x256xf32>
    %31 = arith.divf %29, %30 : vector<32x256xf32>
    %32 = arith.mulf %26, %31 : vector<32x256xf32>
    %c17_i32 = arith.constant 17 : i32
    %33 = tpu.dynamic_rotate %32 by %c17_i32 dim 1 : vector<32x256xf32>, i32 -> vector<32x256xf32>
    %c0_12 = arith.constant 0 : index
    %c0_13 = arith.constant 0 : index
    %c0_14 = arith.constant 0 : index
    %34 = vector.load %arg6[%c0_12, %c0_13, %c0_14] : memref<9x1x256xf32, #tpu.memory_space<vmem>>, vector<1x1x256xf32>
    %35 = vector.shape_cast %34 : vector<1x1x256xf32> to vector<1x256xf32>
    %36 = vector.broadcast %35 : vector<1x256xf32> to vector<32x256xf32>
    %37 = arith.mulf %33, %36 : vector<32x256xf32>
    %38 = arith.truncf %37 : vector<32x256xf32> to vector<32x256xbf16>
    %c0_15 = arith.constant 0 : index
    %c0_16 = arith.constant 0 : index
    %39 = vector.load %arg8[%c0_15, %c0_16] : memref<288x256xbf16, #tpu.memory_space<vmem>>, vector<32x256xbf16>
    tpu.vector_store %arg8[%c0_15, %c0_16], %38 {strides = array<i32>} : memref<288x256xbf16, #tpu.memory_space<vmem>>, vector<32x256xbf16>,
    %c16_i32 = arith.constant 16 : i32
    %40 = tpu.dynamic_rotate %32 by %c16_i32 dim 1 : vector<32x256xf32>, i32 -> vector<32x256xf32>
    %c1 = arith.constant 1 : index
    %c0_17 = arith.constant 0 : index
    %c0_18 = arith.constant 0 : index
    %41 = vector.load %arg6[%c1, %c0_17, %c0_18] : memref<9x1x256xf32, #tpu.memory_space<vmem>>, vector<1x1x256xf32>
    %42 = vector.shape_cast %41 : vector<1x1x256xf32> to vector<1x256xf32>
    %43 = vector.broadcast %42 : vector<1x256xf32> to vector<32x256xf32>
    %44 = arith.mulf %40, %43 : vector<32x256xf32>
    %45 = arith.truncf %44 : vector<32x256xf32> to vector<32x256xbf16>
    %c32 = arith.constant 32 : index
    %c0_19 = arith.constant 0 : index
    %46 = vector.load %arg8[%c32, %c0_19] : memref<288x256xbf16, #tpu.memory_space<vmem>>, vector<32x256xbf16>
    tpu.vector_store %arg8[%c32, %c0_19], %45 {strides = array<i32>} : memref<288x256xbf16, #tpu.memory_space<vmem>>, vector<32x256xbf16>,
    %c15_i32 = arith.constant 15 : i32
    %47 = tpu.dynamic_rotate %32 by %c15_i32 dim 1 : vector<32x256xf32>, i32 -> vector<32x256xf32>
    %c2 = arith.constant 2 : index
    %c0_20 = arith.constant 0 : index
    %c0_21 = arith.constant 0 : index
    %48 = vector.load %arg6[%c2, %c0_20, %c0_21] : memref<9x1x256xf32, #tpu.memory_space<vmem>>, vector<1x1x256xf32>
    %49 = vector.shape_cast %48 : vector<1x1x256xf32> to vector<1x256xf32>
    %50 = vector.broadcast %49 : vector<1x256xf32> to vector<32x256xf32>
    %51 = arith.mulf %47, %50 : vector<32x256xf32>
    %52 = arith.truncf %51 : vector<32x256xf32> to vector<32x256xbf16>
    %c64 = arith.constant 64 : index
    %c0_22 = arith.constant 0 : index
    %53 = vector.load %arg8[%c64, %c0_22] : memref<288x256xbf16, #tpu.memory_space<vmem>>, vector<32x256xbf16>
    tpu.vector_store %arg8[%c64, %c0_22], %52 {strides = array<i32>} : memref<288x256xbf16, #tpu.memory_space<vmem>>, vector<32x256xbf16>,
    %c1_i32 = arith.constant 1 : i32
    %54 = tpu.dynamic_rotate %32 by %c1_i32 dim 1 : vector<32x256xf32>, i32 -> vector<32x256xf32>
    %c3 = arith.constant 3 : index
    %c0_23 = arith.constant 0 : index
    %c0_24 = arith.constant 0 : index
    %55 = vector.load %arg6[%c3, %c0_23, %c0_24] : memref<9x1x256xf32, #tpu.memory_space<vmem>>, vector<1x1x256xf32>
    %56 = vector.shape_cast %55 : vector<1x1x256xf32> to vector<1x256xf32>
    %57 = vector.broadcast %56 : vector<1x256xf32> to vector<32x256xf32>
    %58 = arith.mulf %54, %57 : vector<32x256xf32>
    %59 = arith.truncf %58 : vector<32x256xf32> to vector<32x256xbf16>
    %c96 = arith.constant 96 : index
    %c0_25 = arith.constant 0 : index
    %60 = vector.load %arg8[%c96, %c0_25] : memref<288x256xbf16, #tpu.memory_space<vmem>>, vector<32x256xbf16>
    tpu.vector_store %arg8[%c96, %c0_25], %59 {strides = array<i32>} : memref<288x256xbf16, #tpu.memory_space<vmem>>, vector<32x256xbf16>,
    %61 = arith.truncf %32 : vector<32x256xf32> to vector<32x256xbf16>
    %c128 = arith.constant 128 : index
    %c0_26 = arith.constant 0 : index
    %62 = vector.load %arg8[%c128, %c0_26] : memref<288x256xbf16, #tpu.memory_space<vmem>>, vector<32x256xbf16>
    tpu.vector_store %arg8[%c128, %c0_26], %61 {strides = array<i32>} : memref<288x256xbf16, #tpu.memory_space<vmem>>, vector<32x256xbf16>,
    %c255_i32 = arith.constant 255 : i32
    %63 = tpu.dynamic_rotate %32 by %c255_i32 dim 1 : vector<32x256xf32>, i32 -> vector<32x256xf32>
    %c5 = arith.constant 5 : index
    %c0_27 = arith.constant 0 : index
    %c0_28 = arith.constant 0 : index
    %64 = vector.load %arg6[%c5, %c0_27, %c0_28] : memref<9x1x256xf32, #tpu.memory_space<vmem>>, vector<1x1x256xf32>
    %65 = vector.shape_cast %64 : vector<1x1x256xf32> to vector<1x256xf32>
    %66 = vector.broadcast %65 : vector<1x256xf32> to vector<32x256xf32>
    %67 = arith.mulf %63, %66 : vector<32x256xf32>
    %68 = arith.truncf %67 : vector<32x256xf32> to vector<32x256xbf16>
    %c160 = arith.constant 160 : index
    %c0_29 = arith.constant 0 : index
    %69 = vector.load %arg8[%c160, %c0_29] : memref<288x256xbf16, #tpu.memory_space<vmem>>, vector<32x256xbf16>
    tpu.vector_store %arg8[%c160, %c0_29], %68 {strides = array<i32>} : memref<288x256xbf16, #tpu.memory_space<vmem>>, vector<32x256xbf16>,
    %c241_i32 = arith.constant 241 : i32
    %70 = tpu.dynamic_rotate %32 by %c241_i32 dim 1 : vector<32x256xf32>, i32 -> vector<32x256xf32>
    %c6 = arith.constant 6 : index
    %c0_30 = arith.constant 0 : index
    %c0_31 = arith.constant 0 : index
    %71 = vector.load %arg6[%c6, %c0_30, %c0_31] : memref<9x1x256xf32, #tpu.memory_space<vmem>>, vector<1x1x256xf32>
    %72 = vector.shape_cast %71 : vector<1x1x256xf32> to vector<1x256xf32>
    %73 = vector.broadcast %72 : vector<1x256xf32> to vector<32x256xf32>
    %74 = arith.mulf %70, %73 : vector<32x256xf32>
    %75 = arith.truncf %74 : vector<32x256xf32> to vector<32x256xbf16>
    %c192 = arith.constant 192 : index
    %c0_32 = arith.constant 0 : index
    %76 = vector.load %arg8[%c192, %c0_32] : memref<288x256xbf16, #tpu.memory_space<vmem>>, vector<32x256xbf16>
    tpu.vector_store %arg8[%c192, %c0_32], %75 {strides = array<i32>} : memref<288x256xbf16, #tpu.memory_space<vmem>>, vector<32x256xbf16>,
    %c240_i32 = arith.constant 240 : i32
    %77 = tpu.dynamic_rotate %32 by %c240_i32 dim 1 : vector<32x256xf32>, i32 -> vector<32x256xf32>
    %c7 = arith.constant 7 : index
    %c0_33 = arith.constant 0 : index
    %c0_34 = arith.constant 0 : index
    %78 = vector.load %arg6[%c7, %c0_33, %c0_34] : memref<9x1x256xf32, #tpu.memory_space<vmem>>, vector<1x1x256xf32>
    %79 = vector.shape_cast %78 : vector<1x1x256xf32> to vector<1x256xf32>
    %80 = vector.broadcast %79 : vector<1x256xf32> to vector<32x256xf32>
    %81 = arith.mulf %77, %80 : vector<32x256xf32>
    %82 = arith.truncf %81 : vector<32x256xf32> to vector<32x256xbf16>
    %c224 = arith.constant 224 : index
    %c0_35 = arith.constant 0 : index
    %83 = vector.load %arg8[%c224, %c0_35] : memref<288x256xbf16, #tpu.memory_space<vmem>>, vector<32x256xbf16>
    tpu.vector_store %arg8[%c224, %c0_35], %82 {strides = array<i32>} : memref<288x256xbf16, #tpu.memory_space<vmem>>, vector<32x256xbf16>,
    %c239_i32 = arith.constant 239 : i32
    %84 = tpu.dynamic_rotate %32 by %c239_i32 dim 1 : vector<32x256xf32>, i32 -> vector<32x256xf32>
    %c8 = arith.constant 8 : index
    %c0_36 = arith.constant 0 : index
    %c0_37 = arith.constant 0 : index
    %85 = vector.load %arg6[%c8, %c0_36, %c0_37] : memref<9x1x256xf32, #tpu.memory_space<vmem>>, vector<1x1x256xf32>
    %86 = vector.shape_cast %85 : vector<1x1x256xf32> to vector<1x256xf32>
    %87 = vector.broadcast %86 : vector<1x256xf32> to vector<32x256xf32>
    %88 = arith.mulf %84, %87 : vector<32x256xf32>
    %89 = arith.truncf %88 : vector<32x256xf32> to vector<32x256xbf16>
    %c256 = arith.constant 256 : index
    %c0_38 = arith.constant 0 : index
    %90 = vector.load %arg8[%c256, %c0_38] : memref<288x256xbf16, #tpu.memory_space<vmem>>, vector<32x256xbf16>
    tpu.vector_store %arg8[%c256, %c0_38], %89 {strides = array<i32>} : memref<288x256xbf16, #tpu.memory_space<vmem>>, vector<32x256xbf16>,
    %c0_39 = arith.constant 0 : index
    %c0_40 = arith.constant 0 : index
    %91 = vector.load %arg4[%c0_39, %c0_40] : memref<64x288xbf16, #tpu.memory_space<vmem>>, vector<64x288xbf16>
    %c0_41 = arith.constant 0 : index
    %c0_42 = arith.constant 0 : index
    %92 = vector.load %arg8[%c0_41, %c0_42] : memref<288x256xbf16, #tpu.memory_space<vmem>>, vector<288x256xbf16>
    %cst_43 = arith.constant dense<0.000000e+00> : vector<64x256xf32>
    %93 = tpu.matmul %91, %92, %cst_43 {dimension_numbers = #tpu.dot_dimension_numbers<[1], [0], [0], [1], [0, 0, 1, 1], [], []>} : vector<64x288xbf16>, vector<288x256xbf16>, vector<64x256xf32> -> vector<64x256xf32>
    %c0_44 = arith.constant 0 : index
    %c0_45 = arith.constant 0 : index
    %94 = vector.load %arg5[%c0_44, %c0_45] : memref<64x1xf32, #tpu.memory_space<vmem>>, vector<64x1xf32>
    %95 = vector.broadcast %94 : vector<64x1xf32> to vector<64x256xf32>
    %96 = arith.addf %93, %95 : vector<64x256xf32>
    %c0_46 = arith.constant 0 : index
    %c0_47 = arith.constant 0 : index
    %c0_48 = arith.constant 0 : index
    %97 = vector.load %arg7[%c0_46, %c0_47, %c0_48] : memref<1x64x256xf32, #tpu.memory_space<vmem>>, vector<1x64x256xf32>
    %98 = vector.shape_cast %97 : vector<1x64x256xf32> to vector<64x256xf32>
    %99 = vector.shape_cast %96 : vector<64x256xf32> to vector<1x64x256xf32>
    tpu.vector_store %arg7[%c0_46, %c0_47, %c0_48], %99 {strides = array<i32>} : memref<1x64x256xf32, #tpu.memory_space<vmem>>, vector<1x64x256xf32>,
    return
  }
  func.func @transform_0(%arg0: i32) -> (i32, i32, i32) {
    %c0_i32 = arith.constant 0 : i32
    %c0_i32_0 = arith.constant 0 : i32
    %c0_i32_1 = arith.constant 0 : i32
    return %arg0, %c0_i32, %c0_i32_0 : i32, i32, i32
  }
  func.func @transform_1(%arg0: i32) -> (i32, i32) {
    %c0_i32 = arith.constant 0 : i32
    %c0_i32_0 = arith.constant 0 : i32
    %c0_i32_1 = arith.constant 0 : i32
    return %c0_i32, %c0_i32_0 : i32, i32
  }
  func.func @transform_2(%arg0: i32) -> (i32, i32) {
    %c0_i32 = arith.constant 0 : i32
    %c0_i32_0 = arith.constant 0 : i32
    %c0_i32_1 = arith.constant 0 : i32
    return %c0_i32, %c0_i32_0 : i32, i32
  }
  func.func @transform_3(%arg0: i32) -> (i32, i32) {
    %c0_i32 = arith.constant 0 : i32
    %c0_i32_0 = arith.constant 0 : i32
    %c0_i32_1 = arith.constant 0 : i32
    return %c0_i32, %c0_i32_0 : i32, i32
  }
  func.func @transform_4(%arg0: i32) -> (i32, i32) {
    %c0_i32 = arith.constant 0 : i32
    %c0_i32_0 = arith.constant 0 : i32
    %c0_i32_1 = arith.constant 0 : i32
    return %c0_i32, %c0_i32_0 : i32, i32
  }
  func.func @transform_5(%arg0: i32) -> (i32, i32, i32) {
    %c0_i32 = arith.constant 0 : i32
    %c0_i32_0 = arith.constant 0 : i32
    %c0_i32_1 = arith.constant 0 : i32
    %c0_i32_2 = arith.constant 0 : i32
    return %c0_i32, %c0_i32_0, %c0_i32_1 : i32, i32, i32
  }
  func.func @transform_6(%arg0: i32) -> (i32, i32, i32) {
    %c0_i32 = arith.constant 0 : i32
    %c0_i32_0 = arith.constant 0 : i32
    %c0_i32_1 = arith.constant 0 : i32
    return %arg0, %c0_i32, %c0_i32_0 : i32, i32, i32
  }
}

</mosaic_0001>

<bundles_post_ra>
// kernel: tpu_custom_call.1
= control target key start
LH: loop header
LB: loop body
LE: loop exit
PB: predicated region body
PF: predicated region fallthrough
CT: control target
= control target key end

     0   :  { %11 = vsyncpa [#allocation4], 0  ;;  %s3033_s0 = inlined_call_operand.hbm [shape: f32[2,32,256], index: 0, kind: input, shape index: {}]   ;;  %s3034_s1 = inlined_call_operand.vmem [shape: f32[32,1], index: 1, kind: input, shape index: {}]   ;;  %s3035_s2 = inlined_call_operand.vmem [shape: f32[32,1], index: 2, kind: input, shape index: {}]   ;;  %s3036_s3 = inlined_call_operand.vmem [shape: bf16[64,288], index: 3, kind: input, shape index: {}]   ;;  %s3037_s4 = inlined_call_operand.vmem [shape: f32[64,1], index: 4, kind: input, shape index: {}]   ;;  %s3038_s5 = inlined_call_operand.vmem [shape: f32[9,1,256], index: 5, kind: input, shape index: {}]   ;;  %s3039_s6 = inlined_call_operand.hbm [shape: f32[2,64,256], index: 6, kind: output, shape index: {}]  }
   0x1   :  { %13 = vsyncpa [#allocation4 + $0x1], 0 }
   0x2   :  { %14 = vsyncpa [#allocation5], 0 }
   0x3   :  { %16 = vsyncpa [#allocation5 + $0x1], 0  ;;  %s2173_s21 = smov 0   ;;  %s2175_s22 = smov 0  }
   0x4   :  { %s2177_s23 = smov 0   ;;  %s2179_s24 = smov 0  }
   0x5 LB: > { %s2194_s25 = sadd.s32 4294967295, %s2124_s24   ;;  %s1638_s26 = sadd.s32 4294967294, %s2124_s24   ;;  %s2124_s24 = sphi %s2179_s24, %s3055_s24   ;;  %s2120_s23 = sphi %s2177_s23, %s3054_s23   ;;  %s2116_s22 = sphi %s2175_s22, %s3053_s22   ;;  %s2112_s21 = sphi %s2173_s21, %s3052_s21  }
   0x6   : > { %s2198_s27 = sadd.s32 1, %s2124_s24   ;;  %s29_s28 = sadd.s32 1, %s2120_s23 }
   0x7   : > { %s26_s29 = ssub.s32 %s2124_s24, %s2198_s27  ;;  %p36_p0 = scmp.ne.s32.totalorder %s2120_s23, %s2116_s22 }
   0x8   : > { %p27_p1 = scmp.eq.s32.totalorder %s26_s29, 0  ;;  %p37_p2 = scmp.eq.s32.totalorder %s2124_s24, 0 }
   0x9   : > { %p42_p3 = scmp.ne.s32.totalorder %s2116_s22, %s2112_s21  ;;  %p43_p4 = scmp.eq.s32.totalorder %s2194_s25, 0 }
   0xa   : > { %s2210_s30 = scalar_select %p27_p1, %s2120_s23, %s29_s28  }
   0xb   : > { %p2212_p5 = por %p37_p2, %p36_p0  ;;  %p2216_p6 = por %p43_p4, %p42_p3 }
   0xc   : > { %p171_p7 = scmp.eq.s32.totalorder %s2194_s25, 1  ;;  %p177_p8 = scmp.eq.s32.totalorder %s1638_s26, 1 }
   0xd   : > { %p1939_p10 = scmp.lt.s32.totalorder %s2124_s24, 2  ;;  %s212_s11 = sand.u32 1, %s2120_s23  }
   0xe   : > { %p2223_p11 = por %p171_p7, %p36_p0  ;;  %p2227_p12 = por %p177_p8, %p42_p3 }
   0xf   : > { %s1867_s12 = sshll.u32 %s2124_s24, 6  ;;  %s1641_s13 = sshll.u32 %s212_s11, 6 }
  0x10   : > { %s221_s16 = scalar_lea.hbm %s3033_s0, %s1867_s12  ;;  %s216_s18 = scalar_lea.vmem [#allocation3], %s1641_s13 }
  0x11   : > { %s222_s17 = sshll.u32 %s221_s16, 4  ;;  %s224_s19 = sshll.u32 %s216_s18, 4  ;;  %s223_s17 = int_to_ptr.hbm [resolvable:$true] %s222_s17  ;;  %s225_s19 = int_to_ptr.vmem [resolvable:$true] %s224_s19 }
  0x12   : > { %p2238_p13 = pnand %p1939_p10, %p2212_p5  ;;  %p1644_p0 = scmp.ge.s32.totalorder %s2124_s24, 1 }
  0x13   : > { %p232_p1 = scmp.lt.s32.totalorder %s2124_s24, 3  ;;  %s213_s26 = scalar_lea.sflag [#allocation4], %s212_s11 }
  0x14   : > { %s2028_s28 = sshra.s32 %s223_s17, 4  ;;  %p2032_p3 = pneg %p2238_p13  ;;  %s2029_s28 = int_to_ptr.hbm [resolvable:$true] %s2028_s28 }
  0x15   : > { %s2030_s29 = scalar_lea.hbm %s2029_s28, 64  ;;  %s2035_s7 = scalar_lea.hbm %s3033_s0, 128 }
  0x16   : > { %p2031_p2 = scmp.ne.s32.totalorder %s2029_s28, %s2030_s29  ;;  %p2036_p5 = scmp.lt.s32.totalorder %s2029_s28, %s3033_s0 }
  0x17   : > { %p2037_p8 = scmp.lt.s32.totalorder %s2035_s7, %s2030_s29 }
  0x18   : > { %p2033_p4 = pnand %p2032_p3, %p2031_p2 }
  0x19   : > { %p2038_p10 = por %p2037_p8, %p2036_p5 }
  0x1a   : > { %p2034_p7 = pneg %p2033_p4 }
  0x1c   : > { %p2039_p9 = pnand %p2038_p10, %p2034_p7 }
  0x1e   : > { %2042 = shalt.err (!%p2039_p9)
}
  0x1f   : > { %s2126_s11 = smov 256   ;;  %s2127_s16 = smov 16  }
  0x20   : > { %1934 = dma.hbm_to_vmem [thread:$0]  (!%p2238_p13), %s223_s17, 1024, %s225_s19, %s213_s26, %s2126_s11, %s2126_s11, %s2127_s16  }
  0x21   : > { %p233_p2 = pnand %p1644_p0, %p232_p1 }
  0x22   : > { %s2259_s18 = sand.u32 (!%p233_p2), 1, %s2116_s22  }
  0x23   : > { %236 = sbr.rel (%p233_p2) target bundleno = 866 (0x362), region = 44  ;;  %s1645_s28 = sshll.u32 (!%p233_p2), %s2259_s18, 6 }
  0x24   : > { %s239_s29 = scalar_lea.sflag (!%p233_p2), [#allocation4], %s2259_s18  ;;  %s242_s12 = scalar_lea.vmem (!%p233_p2), [#allocation3], %s1645_s28 }
  0x28   : > { %2103 = dma.done.wait (%p2216_p6), %s239_s29, 1024  }
  0x29   : > { %2105 = vsyncadd (%p2216_p6), %s239_s29, 4294966272  ;;  %v2267_v0 = vld [vmem:[%s242_s12 + $0x20] sm:$0xff]  ;;  %v2269_v1 = vld [vmem:[%s242_s12 + $0x28] sm:$0xff]  ;;  %v2128_v24 = vmov 0   ;;  %s2129_s19 = smov 1   ;;  %s2130_s20 = smov 15  }
  0x2a   : > { %v287_v2 = vadd.f32 %v2269_v1, %v2267_v0  ;;  %v297_v3 = vmul.f32 %v2267_v0, %v2267_v0  ;;  %v298_v4 = vmul.f32 %v2269_v1, %v2269_v1  ;;  %v2277_v5 = vld [vmem:[%s242_s12] sm:$0xff]  ;;  %v2279_v6 = vld [vmem:[%s242_s12 + $0x8] sm:$0xff]  ;;  %v2281_v7 = vld [vmem:[%s242_s12 + $0x30] sm:$0xff]  ;;  %1985 = vset.pattern.permute.xlu2 %v2128_v24  ;;  %1986 = vset.pattern.permute.xlu0 %v2128_v24  ;;  %s2131_s26 = smov 16   ;;  %s2132_s13 = smov 111  }
  0x2b   : > { %v2283_v8 = vld [vmem:[%s242_s12 + $0x38] sm:$0xff]  ;;  %v281_v9 = vadd.f32 %v2279_v6, %v2277_v5  ;;  %v299_v11 = vmul.f32 %v2281_v7, %v2281_v7  ;;  %v2291_v13 = vld [vmem:[%s242_s12 + $0x10] sm:$0xff]  ;;  %v293_v18 = vmul.f32 %v2277_v5, %v2277_v5  ;;  %v294_v19 = vmul.f32 %v2279_v6, %v2279_v6  ;;  %1987 = vset.pattern.permute.xlu1 %v2128_v24  ;;  %s2133_s7 = smov 17   ;;  %s2134_s14 = smov 112  }
  0x2c   : > { %288 = vadd.xlane.f32.xlu0 %v287_v2  ;;  %v307_v10 = vadd.f32 %v298_v4, %v297_v3  ;;  %v300_v12 = vmul.f32 %v2283_v8, %v2283_v8  ;;  %v2293_v14 = vld [vmem:[%s242_s12 + $0x18] sm:$0xff]  ;;  %v290_v15 = vadd.f32 %v2283_v8, %v2281_v7  ;;  %v295_v20 = vmul.f32 %v2291_v13, %v2291_v13  ;;  %v379_v3 = vld [vmem:[%s3034_s1 + $0x10] sm:$0xff]  ;;  %s2135_s16 = smov 113   ;;  %s2136_s12 = smov 127  }
  0x2d   : > { %282 = vadd.xlane.f32.xlu2 %v281_v9  ;;  %v284_v16 = vadd.f32 %v2293_v14, %v2291_v13  ;;  %v296_v21 = vmul.f32 %v2293_v14, %v2293_v14  ;;  %v301_v22 = vadd.f32 %v294_v19, %v293_v18  ;;  %s1646_s29 = sshll.u32 %s2259_s18, 7  ;;  %s1916_s8 = sshll.u32 %s2194_s25, 7 }
  0x2e   : > { %308 = vadd.xlane.f32.xlu1 %v307_v10  ;;  %v310_v17 = vadd.f32 %v300_v12, %v299_v11  ;;  %s1550_s25 = scalar_lea.sflag [#allocation5], %s2259_s18  ;;  %s2078_s28 = scalar_lea.hbm %s3039_s6, 256 }
  0x2f   : > { %v304_v23 = vadd.f32 %v296_v21, %v295_v20  ;;  %v380_v21 = vld [vmem:[%s3034_s1 + $0x18] sm:$0xff] }
  0x34   : > { %291 = vadd.xlane.f32.xlu0 %v290_v15 }
  0x35   : > { %285 = vadd.xlane.f32.xlu2 %v284_v16 }
  0x36   : > { %311 = vadd.xlane.f32.xlu1 %v310_v17 }
  0x3c   : > { %302 = vadd.xlane.f32.xlu0 %v301_v22 }
  0x3e   : > { %305 = vadd.xlane.f32.xlu1 %v304_v23 }
  0x9f   : > { %v289_v25 = vpop.xlane.xlu0 %288 }
  0xa0   : > { %v2307_v26 = vmul.f32 0.00390625, %v289_v25  ;;  %v283_v27 = vpop.xlane.xlu2 %282 }
  0xa1   : > { %v309_v28 = vpop.xlane.xlu1 %308  ;;  %v2315_v40 = vmul.f32 0.00390625, %v283_v27 }
  0xa2   : > { %v323_v29 = vmul.f32 %v2307_v26, %v2307_v26  ;;  %v319_v30 = vmul.f32 0.00390625, %v309_v28 }
  0xa3   : > { %v321_v46 = vmul.f32 %v2315_v40, %v2315_v40 }
  0xa4   : > { %v327_v31 = vsub.f32 %v319_v30, %v323_v29 }
  0xa6   : > { %v331_v32 = vmax.f32 %v327_v31, 0.0  ;;  %v377_v31 = vld [vmem:[%s3034_s1] sm:$0xff] }
  0xa7   : > { %v292_v33 = vpop.xlane.xlu0 %291 }
  0xa8   : > { %v335_v34 = vadd.f32 1e-06, %v331_v32  ;;  %v2311_v35 = vmul.f32 0.00390625, %v292_v33  ;;  %v286_v37 = vpop.xlane.xlu2 %285 }
  0xa9   : > { %v312_v36 = vpop.xlane.xlu1 %311  ;;  %v2317_v42 = vmul.f32 0.00390625, %v286_v37 }
  0xaa   : > { %1988 = vrsqrt.f32 %v335_v34  ;;  %v324_v38 = vmul.f32 %v2311_v35, %v2311_v35  ;;  %v320_v39 = vmul.f32 0.00390625, %v312_v36  ;;  %vm363_vm1 = vweird.f32 %v335_v34 }
  0xab   : > { %v322_v49 = vmul.f32 %v2317_v42, %v2317_v42 }
  0xac   : > { %v328_v41 = vsub.f32 %v320_v39, %v324_v38 }
  0xae   : > { %v332_v43 = vmax.f32 %v328_v41, 0.0  ;;  %v388_v41 = vld [vmem:[%s3035_s2 + $0x18] sm:$0xff] }
  0xaf   : > { %v303_v44 = vpop.xlane.xlu0 %302 }
  0xb0   : > { %v1989_v45 = vpop.eup %1988  ;;  %v336_v47 = vadd.f32 1e-06, %v332_v43  ;;  %v317_v48 = vmul.f32 0.00390625, %v303_v44  ;;  %v387_v44 = vld [vmem:[%s3035_s2 + $0x10] sm:$0xff] }
  0xb1   : > { %v358_v50 = vmul.f32 %v1989_v45, %v335_v34  ;;  %v306_v51 = vpop.xlane.xlu1 %305  ;;  %vm364_vm0 = vweird.f32 %v1989_v45  ;;  %v378_v34 = vld [vmem:[%s3034_s1 + $0x8] sm:$0xff] }
  0xb2   : > { %1990 = vrsqrt.f32 %v336_v47  ;;  %v325_v52 = vsub.f32 %v317_v48, %v321_v46  ;;  %v318_v53 = vmul.f32 0.00390625, %v306_v51  ;;  %vm365_vm2 = vmor %vm363_vm1, %vm364_vm0  ;;  %vm373_vm4 = vweird.f32 %v336_v47 }
  0xb3   : > { %v359_v54 = vmul.f32 %v1989_v45, %v358_v50 }
  0xb4   : > { %v329_v55 = vmax.f32 %v325_v52, 0.0  ;;  %v326_v56 = vsub.f32 %v318_v53, %v322_v49 }
  0xb5   : > { %v360_v57 = vmul.f32 0.5, %v359_v54 }
  0xb6   : > { %v333_v58 = vadd.f32 1e-06, %v329_v55  ;;  %v330_v59 = vmax.f32 %v326_v56, 0.0 }
  0xb7   : > { %v361_v60 = vsub.f32 1.5, %v360_v57 }
  0xb8   : > { %v1991_v61 = vpop.eup %1990  ;;  %1992 = vrsqrt.f32 %v333_v58  ;;  %v334_v62 = vadd.f32 1e-06, %v330_v59  ;;  %vm343_vm7 = vweird.f32 %v333_v58 }
  0xb9   : > { %v368_v63 = vmul.f32 %v1991_v61, %v336_v47  ;;  %v362_v2 = vmul.f32 %v1989_v45, %v361_v60  ;;  %vm374_vm3 = vweird.f32 %v1991_v61 }
  0xba   : > { %1994 = vrsqrt.f32 %v334_v62  ;;  %vm375_vm5 = vmor %vm373_vm4, %vm374_vm3  ;;  %vm353_vm10 = vweird.f32 %v334_v62 }
  0xbb   : > { %v369_v4 = vmul.f32 %v1991_v61, %v368_v63  ;;  %v366_v9 = vsel %vm365_vm2, %v1989_v45, %v362_v2 }
  0xbc   : > { %v383_v10 = vmul.f32 %v379_v3, %v366_v9 }
  0xbd   : > { %v370_v11 = vmul.f32 0.5, %v369_v4 }
  0xbe   : > { %v1993_v12 = vpop.eup %1992  ;;  %409 = vperm.xlu2 %1985, %v383_v10   ;;  %v391_v43 = vmul.f32 %v383_v10, %v2307_v26  ;;  %v386_v26 = vld [vmem:[%s3035_s2 + $0x8] sm:$0xff] }
  0xbf   : > { %v371_v15 = vsub.f32 1.5, %v370_v11  ;;  %v338_v16 = vmul.f32 %v1993_v12, %v333_v58  ;;  %vm344_vm6 = vweird.f32 %v1993_v12 }
  0xc0   : > { %v1995_v17 = vpop.eup %1994  ;;  %vm345_vm9 = vmor %vm343_vm7, %vm344_vm6  ;;  %v395_v46 = vsub.f32 %v387_v44, %v391_v43 }
  0xc1   : > { %v339_v18 = vmul.f32 %v1993_v12, %v338_v16  ;;  %v348_v19 = vmul.f32 %v1995_v17, %v334_v62  ;;  %v372_v20 = vmul.f32 %v1991_v61, %v371_v15  ;;  %vm354_vm8 = vweird.f32 %v1995_v17 }
  0xc2   : > { %vm355_vm11 = vmor %vm353_vm10, %vm354_vm8 }
  0xc3   : > { %v340_v22 = vmul.f32 0.5, %v339_v18  ;;  %v349_v23 = vmul.f32 %v1995_v17, %v348_v19  ;;  %v376_v24 = vsel %vm375_vm5, %v1991_v61, %v372_v20 }
  0xc4   : > { %v384_v25 = vmul.f32 %v380_v21, %v376_v24 }
  0xc5   : > { %v341_v27 = vsub.f32 1.5, %v340_v22  ;;  %v350_v28 = vmul.f32 0.5, %v349_v23 }
  0xc6   : > { %414 = vperm.xlu0 %1986, %v384_v25   ;;  %v392_v39 = vmul.f32 %v384_v25, %v2311_v35  ;;  %v385_v35 = vld [vmem:[%s3035_s2] sm:$0xff] }
  0xc7   : > { %v351_v29 = vsub.f32 1.5, %v350_v28  ;;  %v342_v30 = vmul.f32 %v1993_v12, %v341_v27 }
  0xc8   : > { %v396_v45 = vsub.f32 %v388_v41, %v392_v39 }
  0xc9   : > { %v346_v32 = vsel %vm345_vm9, %v1993_v12, %v342_v30  ;;  %v352_v33 = vmul.f32 %v1995_v17, %v351_v29 }
  0xca   : > { %v381_v36 = vmul.f32 %v377_v31, %v346_v32 }
  0xcb   : > { %v356_v37 = vsel %vm355_vm11, %v1995_v17, %v352_v33 }
  0xcc   : > { %399 = vperm.xlu2 %1985, %v381_v36   ;;  %v382_v38 = vmul.f32 %v378_v34, %v356_v37  ;;  %v389_v47 = vmul.f32 %v381_v36, %v2315_v40 }
  0xce   : > { %404 = vperm.xlu1 %1987, %v382_v38   ;;  %v390_v48 = vmul.f32 %v382_v38, %v2317_v42  ;;  %v393_v49 = vsub.f32 %v385_v35, %v389_v47 }
  0xd0   : > { %v394_v50 = vsub.f32 %v386_v26, %v390_v48 }
  0xd4   : > { %442 = vperm.xlu2 %1985, %v396_v45  }
  0xd6   : > { %437 = vperm.xlu1 %1987, %v395_v46  }
  0xdc   : > { %427 = vperm.xlu2 %1985, %v393_v49  }
  0xde   : > { %432 = vperm.xlu1 %1987, %v394_v50  }
 0x118   : > { %v410_v51 = vpop.permute.xlu2 %409 }
 0x119   : > { %v421_v12 = vmul.f32 %v410_v51, %v2267_v0  ;;  %v422_v18 = vmul.f32 %v410_v51, %v2269_v1 }
 0x126   : > { %v400_v52 = vpop.permute.xlu2 %399 }
 0x127   : > { %v417_v54 = vmul.f32 %v400_v52, %v2277_v5  ;;  %v418_v40 = vmul.f32 %v400_v52, %v2279_v6 }
 0x12e   : > { %v443_v53 = vpop.permute.xlu2 %442 }
 0x136   : > { %v428_v55 = vpop.permute.xlu2 %427 }
 0x137   : > { %v2353_v56 = vadd.f32 %v428_v55, %v417_v54  ;;  %v2355_v57 = vadd.f32 %v428_v55, %v418_v40 }
 0x138   : > { %v415_v42 = vpop.permute.xlu0 %414 }
 0x139   : > { %v1647_v58 = vmul.f32 -1.442695, %v2353_v56  ;;  %v1648_v59 = vmul.f32 -1.442695, %v2355_v57  ;;  %v423_v60 = vmul.f32 %v415_v42, %v2281_v7  ;;  %v424_v61 = vmul.f32 %v415_v42, %v2283_v8 }
 0x13b   : > { %1996 = vpow2.f32 %v1647_v58  ;;  %v2361_v62 = vadd.f32 %v443_v53, %v423_v60  ;;  %v2363_v5 = vadd.f32 %v443_v53, %v424_v61 }
 0x13c   : > { %1998 = vpow2.f32 %v1648_v59 }
 0x13d   : > { %v1653_v6 = vmul.f32 -1.442695, %v2361_v62  ;;  %v1654_v63 = vmul.f32 -1.442695, %v2363_v5 }
 0x13f   : > { %2000 = vpow2.f32 %v1653_v6 }
 0x140   : > { %2002 = vpow2.f32 %v1654_v63  ;;  %v405_v2 = vpop.permute.xlu1 %404 }
 0x141   : > { %v1997_v3 = vpop.eup %1996  ;;  %v419_v22 = vmul.f32 %v405_v2, %v2291_v13  ;;  %v420_v24 = vmul.f32 %v405_v2, %v2293_v14 }
 0x142   : > { %v1999_v4 = vpop.eup %1998  ;;  %v477_v9 = vadd.f32 1.0, %v1997_v3 }
 0x143   : > { %v478_v10 = vadd.f32 1.0, %v1999_v4 }
 0x144   : > { %2004 = vrcp.f32 %v477_v9  ;;  %v494_v15 = vand.u32 2147483647, %v477_v9  ;;  %v496_v16 = vand.u32 2147483648, %v477_v9  ;;  %vm490_vm12 = vweird.f32 %v477_v9 }
 0x145   : > { %v2001_v7 = vpop.eup %2000  ;;  %2006 = vrcp.f32 %v478_v10  ;;  %v509_v19 = vand.u32 2147483647, %v478_v10  ;;  %v511_v20 = vand.u32 2147483648, %v478_v10  ;;  %vm505_vm14 = vweird.f32 %v478_v10 }
 0x146   : > { %v2003_v8 = vpop.eup %2002  ;;  %v2367_v11 = vadd.f32 1.0, %v2001_v7  ;;  %vm2381_vm13 = vcmp.eq.f32.partialorder %v494_v15, 8.507059e+37  ;;  %v497_v29 = vor.u32 1.1754944e-38, %v496_v16 }
 0x147   : > { %v2370_v17 = vadd.f32 1.0, %v2003_v8  ;;  %vm2385_vm15 = vcmp.eq.f32.partialorder %v509_v19, 8.507059e+37  ;;  %v512_v13 = vor.u32 1.1754944e-38, %v511_v20 }
 0x148   : > { %2008 = vrcp.f32 %v2367_v11  ;;  %v438_v21 = vpop.permute.xlu1 %437  ;;  %vm580_vm0 = vweird.f32 %v2367_v11  ;;  %v584_v34 = vand.u32 2147483647, %v2367_v11  ;;  %v586_v36 = vand.u32 2147483648, %v2367_v11 }
 0x149   : > { %2010 = vrcp.f32 %v2370_v17  ;;  %v2377_v0 = vadd.f32 %v438_v21, %v421_v12  ;;  %v2379_v25 = vadd.f32 %v438_v21, %v422_v18  ;;  %vm595_vm1 = vweird.f32 %v2370_v17 }
 0x14a   : > { %v2005_v23 = vpop.eup %2004  ;;  %v599_v39 = vand.u32 2147483647, %v2370_v17  ;;  %v601_v47 = vand.u32 2147483648, %v2370_v17  ;;  %vm2399_vm4 = vcmp.eq.f32.partialorder %v584_v34, 8.507059e+37  ;;  %v587_v52 = vor.u32 1.1754944e-38, %v586_v36 }
 0x14b   : > { %v2007_v27 = vpop.eup %2006  ;;  %v486_v28 = vmul.f32 %v2005_v23, %v477_v9  ;;  %v1651_v14 = vmul.f32 -1.442695, %v2377_v0  ;;  %v1652_v32 = vmul.f32 -1.442695, %v2379_v25  ;;  %vm491_vm2 = vweird.f32 %v2005_v23 }
 0x14c   : > { %v501_v30 = vmul.f32 %v2007_v27, %v478_v10  ;;  %vm506_vm3 = vweird.f32 %v2007_v27  ;;  %vm492_vm5 = vmor %vm490_vm12, %vm491_vm2  ;;  %v602_v3 = vor.u32 1.1754944e-38, %v601_v47  ;;  %vm600_vm11 = vcmp.eq.f32.partialorder %v599_v39, 8.507059e+37 }
 0x14d   : > { %v487_v33 = vsub.f32 1.0, %v486_v28  ;;  %2012 = vpow2.f32 %v1651_v14  ;;  %vm507_vm6 = vmor %vm505_vm14, %vm506_vm3 }
 0x14e   : > { %v2009_v37 = vpop.eup %2008  ;;  %v502_v38 = vsub.f32 1.0, %v501_v30  ;;  %2014 = vpow2.f32 %v1652_v32 }
 0x14f   : > { %v2011_v41 = vpop.eup %2010  ;;  %v488_v43 = vmul.f32 %v2005_v23, %v487_v33  ;;  %v576_v44 = vmul.f32 %v2009_v37, %v2367_v11  ;;  %vm581_vm7 = vweird.f32 %v2009_v37 }
 0x150   : > { %v503_v45 = vmul.f32 %v2007_v27, %v502_v38  ;;  %v591_v46 = vmul.f32 %v2011_v41, %v2370_v17  ;;  %v433_v35 = vpop.permute.xlu1 %432  ;;  %vm596_vm8 = vweird.f32 %v2011_v41  ;;  %vm582_vm9 = vmor %vm580_vm0, %vm581_vm7 }
 0x151   : > { %v489_v48 = vadd.f32 %v2005_v23, %v488_v43  ;;  %v577_v26 = vsub.f32 1.0, %v576_v44  ;;  %v2403_v50 = vadd.f32 %v433_v35, %v419_v22  ;;  %v2406_v54 = vadd.f32 %v433_v35, %v420_v24  ;;  %vm597_vm10 = vmor %vm595_vm1, %vm596_vm8 }
 0x152   : > { %v504_v51 = vadd.f32 %v2007_v27, %v503_v45  ;;  %v592_v53 = vsub.f32 1.0, %v591_v46 }
 0x153   : > { %v493_v40 = vsel %vm492_vm5, %v2005_v23, %v489_v48  ;;  %v578_v55 = vmul.f32 %v2009_v37, %v577_v26  ;;  %v1649_v42 = vmul.f32 -1.442695, %v2403_v50  ;;  %v2013_v58 = vpop.eup %2012  ;;  %v1650_v7 = vmul.f32 -1.442695, %v2406_v54 }
 0x154   : > { %v498_v59 = vsel %vm2381_vm13, %v497_v29, %v493_v40  ;;  %v508_v60 = vsel %vm507_vm6, %v2007_v27, %v504_v51  ;;  %v593_v61 = vmul.f32 %v2011_v41, %v592_v53  ;;  %v2015_v6 = vpop.eup %2014  ;;  %v481_v4 = vadd.f32 1.0, %v2013_v58 }
 0x155   : > { %v513_v63 = vsel %vm2385_vm15, %v512_v13, %v508_v60  ;;  %v579_v2 = vadd.f32 %v2009_v37, %v578_v55  ;;  %v482_v10 = vadd.f32 1.0, %v2015_v6  ;;  %2016 = vpow2.f32 %v1649_v42 }
 0x156   : > { %v594_v9 = vadd.f32 %v2011_v41, %v593_v61  ;;  %v2418_v8 = vmul.f32 %v498_v59, %v2353_v56  ;;  %v2421_v12 = vmul.f32 %v513_v63, %v2355_v57  ;;  %2018 = vrcp.f32 %v481_v4 }
 0x157   : > { %v583_v15 = vsel %vm582_vm9, %v2009_v37, %v579_v2  ;;  %2020 = vrcp.f32 %v482_v10  ;;  %v554_v28 = vand.u32 2147483647, %v481_v4  ;;  %v556_v1 = vand.u32 2147483648, %v481_v4 }
 0x158   : > { %v588_v11 = vsel %vm2399_vm4, %v587_v52, %v583_v15  ;;  %v598_v16 = vsel %vm597_vm10, %v2011_v41, %v594_v9  ;;  %2022 = vpow2.f32 %v1650_v7  ;;  %v806_v57 = vpack.c.bf16 %v2421_v12, %v2418_v8 }
 0x159   : > { %v603_v18 = vsel %vm600_vm11, %v602_v3, %v598_v16  ;;  %v2428_v19 = vmul.f32 %v588_v11, %v2361_v62  ;;  %v571_v31 = vand.u32 2147483648, %v482_v10  ;;  %v569_v32 = vand.u32 2147483647, %v482_v10  ;;  %v1657_v11 = vld [vmem:[%s3038_s5 + $0x6] sm:$0x3] }
 0x15a   : > { %v2431_v56 = vmul.f32 %v603_v18, %v2363_v5  ;;  %810 = vst [vmem:[#allocation2 + $0x80] sm:$0xff] %v806_v57  ;;  %vm550_vm14 = vweird.f32 %v481_v4  ;;  %v557_v36 = vor.u32 1.1754944e-38, %v556_v1  ;;  %vm565_vm0 = vweird.f32 %v482_v10 }
 0x15b   : > { %764 = vrot.lane.b32.xlu2 %v2428_v19, %s2129_s19  ;;  %v2017_v17 = vpop.eup %2016  ;;  %vm555_vm1 = vcmp.eq.f32.partialorder %v554_v28, 8.507059e+37  ;;  %v572_v39 = vor.u32 1.1754944e-38, %v571_v31  ;;  %vm570_vm3 = vcmp.eq.f32.partialorder %v569_v32, 8.507059e+37  ;;  %v629_v7 = vlaneseq }
 0x15c   : > { %v809_v20 = vpack.c.bf16 %v2431_v56, %v2428_v19  ;;  %v2019_v21 = vpop.eup %2018  ;;  %v479_v22 = vadd.f32 1.0, %v2017_v17  ;;  %v786_v18 = vperm.slane %v1657_v11, 0  ;;  %v787_v57 = vperm.slane %v1657_v11, 1 }
 0x15d   : > { %v2021_v62 = vpop.eup %2020  ;;  %v546_v23 = vmul.f32 %v2019_v21, %v481_v4  ;;  %vm551_vm12 = vweird.f32 %v2019_v21  ;;  %v2512_v15 = vand.u32 127, %v629_v7 }
 0x15e   : > { %813 = vst [vmem:[#allocation2 + $0x98] sm:$0xff] %v809_v20  ;;  %v561_v5 = vmul.f32 %v2021_v62, %v482_v10  ;;  %2024 = vrcp.f32 %v479_v22  ;;  %v2023_v27 = vpop.eup %2022  ;;  %vm566_vm13 = vweird.f32 %v2021_v62  ;;  %vm552_vm15 = vmor %vm550_vm14, %vm551_vm12  ;;  %v526_v48 = vand.u32 2147483648, %v479_v22 }
 0x15f   : > { %v547_v24 = vsub.f32 1.0, %v546_v23  ;;  %v480_v13 = vadd.f32 1.0, %v2023_v27  ;;  %vm567_vm2 = vmor %vm565_vm0, %vm566_vm13  ;;  %v524_v51 = vand.u32 2147483647, %v479_v22  ;;  %vm520_vm5 = vweird.f32 %v479_v22 }
 0x160   : > { %v562_v29 = vsub.f32 1.0, %v561_v5  ;;  %vm774_vm12 = vcmp.lt.s32.totalorder %v2512_v15, 1  ;;  %vm726_vm13 = vcmp.lt.s32.totalorder %v2512_v15, 15  ;;  %vm678_vm14 = vcmp.lt.s32.totalorder %v2512_v15, 16 }
 0x161   : > { %v548_v30 = vmul.f32 %v2019_v21, %v547_v24  ;;  %2026 = vrcp.f32 %v480_v13  ;;  %vm525_vm7 = vcmp.eq.f32.partialorder %v524_v51, 8.507059e+37  ;;  %v541_v42 = vand.u32 2147483648, %v480_v13 }
 0x162   : > { %v563_v14 = vmul.f32 %v2021_v62, %v562_v29  ;;  %v539_v60 = vand.u32 2147483647, %v480_v13  ;;  %vm535_vm9 = vweird.f32 %v480_v13  ;;  %vm631_vm0 = vcmp.lt.s32.totalorder %v2512_v15, 17 }
 0x163   : > { %758 = vrot.lane.b32.xlu2 %v2418_v8, %s2129_s19  ;;  %v549_v33 = vadd.f32 %v2019_v21, %v548_v30  ;;  %v542_v63 = vor.u32 1.1754944e-38, %v541_v42 }
 0x164   : > { %v2025_v34 = vpop.eup %2024  ;;  %v564_v37 = vadd.f32 %v2021_v62, %v563_v14  ;;  %vm540_vm11 = vcmp.eq.f32.partialorder %v539_v60, 8.507059e+37 }
 0x165   : > { %v553_v38 = vsel %vm552_vm15, %v2019_v21, %v549_v33  ;;  %v516_v41 = vmul.f32 %v2025_v34, %v479_v22  ;;  %vm521_vm4 = vweird.f32 %v2025_v34  ;;  %vm974_vm15 = vcmp.lt.s32.totalorder %v2512_v15, 111 }
 0x166   : > { %v558_v43 = vsel %vm555_vm1, %v557_v36, %v553_v38  ;;  %v568_v44 = vsel %vm567_vm2, %v2021_v62, %v564_v37  ;;  %vm522_vm6 = vmor %vm520_vm5, %vm521_vm4  ;;  %v1656_v36 = vld [vmem:[%s3038_s5 + $0x4] sm:$0x3]  ;;  %vm926_vm1 = vcmp.lt.s32.totalorder %v2512_v15, 112  ;;  %vm1346_vm2 = vcmask 261120  }
 0x167   : > { %v573_v45 = vsel %vm570_vm3, %v572_v39, %v568_v44  ;;  %v2442_v46 = vmul.f32 %v558_v43, %v2377_v0  ;;  %v517_v47 = vsub.f32 1.0, %v516_v41  ;;  %v2027_v26 = vpop.eup %2026  ;;  %v2549_v39 = vperm.slane %v1656_v36, 0 }
 0x168   : > { %v2445_v35 = vmul.f32 %v573_v45, %v2379_v25  ;;  %v531_v52 = vmul.f32 %v2027_v26, %v480_v13  ;;  %v527_v25 = vor.u32 1.1754944e-38, %v526_v48  ;;  %vm536_vm8 = vweird.f32 %v2027_v26 }
 0x169   : > { %v518_v49 = vmul.f32 %v2025_v34, %v517_v47  ;;  %762 = vrot.lane.b32.xlu0 %v2442_v46, %s2129_s19  ;;  %vm537_vm10 = vmor %vm535_vm9, %vm536_vm8  ;;  %v2551_v41 = vperm.slane %v1656_v36, 1  ;;  %vm878_vm3 = vcmp.lt.s32.totalorder %v2512_v15, 113  ;;  %vm830_vm4 = vcmp.lt.s32.totalorder %v2512_v15, 127 }
 0x16a   : > { %770 = vrot.lane.b32.xlu1 %v2445_v35, %s2129_s19  ;;  %v808_v0 = vpack.c.bf16 %v2445_v35, %v2442_v46  ;;  %v532_v40 = vsub.f32 1.0, %v531_v52 }
 0x16b   : > { %v519_v53 = vadd.f32 %v2025_v34, %v518_v49 }
 0x16c   : > { %812 = vst [vmem:[#allocation2 + $0x90] sm:$0xff] %v808_v0  ;;  %v533_v59 = vmul.f32 %v2027_v26, %v532_v40 }
 0x16d   : > { %v523_v55 = vsel %vm522_vm6, %v2025_v34, %v519_v53 }
 0x16e   : > { %v528_v58 = vsel %vm525_vm7, %v527_v25, %v523_v55  ;;  %v534_v6 = vadd.f32 %v2027_v26, %v533_v59 }
 0x16f   : > { %v2454_v61 = vmul.f32 %v528_v58, %v2403_v50 }
 0x170   : > { %v538_v2 = vsel %vm537_vm10, %v2027_v26, %v534_v6 }
 0x171   : > { %772 = vrot.lane.b32.xlu0 %v2431_v56, %s2129_s19  ;;  %v543_v3 = vsel %vm540_vm11, %v542_v63, %v538_v2 }
 0x172   : > { %760 = vrot.lane.b32.xlu1 %v2454_v61, %s2129_s19  ;;  %v2461_v4 = vmul.f32 %v543_v3, %v2406_v54 }
 0x174   : > { %768 = vrot.lane.b32.xlu2 %v2461_v4, %s2129_s19  ;;  %v807_v50 = vpack.c.bf16 %v2461_v4, %v2454_v61 }
 0x176   : > { %811 = vst [vmem:[#allocation2 + $0x88] sm:$0xff] %v807_v50 }
 0x179   : > { %766 = vrot.lane.b32.xlu0 %v2421_v12, %s2129_s19 }
 0x17a   : > { %714 = vrot.lane.b32.xlu1 %v2442_v46, %s2130_s20 }
 0x17c   : > { %722 = vrot.lane.b32.xlu2 %v2445_v35, %s2130_s20 }
 0x181   : > { %716 = vrot.lane.b32.xlu0 %v2428_v19, %s2130_s20 }
 0x182   : > { %724 = vrot.lane.b32.xlu1 %v2431_v56, %s2130_s20 }
 0x184   : > { %712 = vrot.lane.b32.xlu2 %v2454_v61, %s2130_s20 }
 0x189   : > { %710 = vrot.lane.b32.xlu0 %v2418_v8, %s2130_s20 }
 0x18a   : > { %718 = vrot.lane.b32.xlu1 %v2421_v12, %s2130_s20 }
 0x18c   : > { %666 = vrot.lane.b32.xlu2 %v2442_v46, %s2131_s26 }
 0x191   : > { %720 = vrot.lane.b32.xlu0 %v2461_v4, %s2130_s20  ;;  %s1561_s20 = scalar_lea.hbm %s3039_s6, %s1916_s8 }
 0x192   : > { %668 = vrot.lane.b32.xlu1 %v2428_v19, %s2131_s26 }
 0x194   : > { %676 = vrot.lane.b32.xlu2 %v2431_v56, %s2131_s26 }
 0x199   : > { %674 = vrot.lane.b32.xlu0 %v2445_v35, %s2131_s26 }
 0x19a   : > { %962 = vrot.lane.b32.xlu1 %v2442_v46, %s2132_s13 }
 0x19c   : > { %970 = vrot.lane.b32.xlu2 %v2445_v35, %s2132_s13 }
 0x1a1   : > { %964 = vrot.lane.b32.xlu0 %v2428_v19, %s2132_s13 }
 0x1a2   : > { %972 = vrot.lane.b32.xlu1 %v2431_v56, %s2132_s13 }
 0x1a4   : > { %664 = vrot.lane.b32.xlu2 %v2454_v61, %s2131_s26 }
 0x1a9   : > { %662 = vrot.lane.b32.xlu0 %v2418_v8, %s2131_s26 }
 0x1aa   : > { %670 = vrot.lane.b32.xlu1 %v2421_v12, %s2131_s26 }
 0x1ac   : > { %958 = vrot.lane.b32.xlu2 %v2418_v8, %s2132_s13 }
 0x1b1   : > { %672 = vrot.lane.b32.xlu0 %v2461_v4, %s2131_s26 }
 0x1b2   : > { %960 = vrot.lane.b32.xlu1 %v2454_v61, %s2132_s13 }
 0x1b4   : > { %968 = vrot.lane.b32.xlu2 %v2461_v4, %s2132_s13 }
 0x1b5   : > { %v765_v54 = vpop.permute.xlu2 %764 }
 0x1b9   : > { %966 = vrot.lane.b32.xlu0 %v2421_v12, %s2132_s13 }
 0x1ba   : > { %617 = vrot.lane.b32.xlu1 %v2442_v46, %s2133_s7 }
 0x1bc   : > { %625 = vrot.lane.b32.xlu2 %v2445_v35, %s2133_s7 }
 0x1bd   : > { %v759_v9 = vpop.permute.xlu2 %758 }
 0x1c1   : > { %619 = vrot.lane.b32.xlu0 %v2428_v19, %s2133_s7 }
 0x1c2   : > { %627 = vrot.lane.b32.xlu1 %v2431_v56, %s2133_s7 }
 0x1c4   : > { %916 = vrot.lane.b32.xlu2 %v2428_v19, %s2134_s14 }
 0x1c9   : > { %914 = vrot.lane.b32.xlu0 %v2442_v46, %s2134_s14 }
 0x1ca   : > { %922 = vrot.lane.b32.xlu1 %v2445_v35, %s2134_s14 }
 0x1cc   : > { %613 = vrot.lane.b32.xlu2 %v2418_v8, %s2133_s7 }
 0x1ce   : > { %v769_v10 = vpop.permute.xlu2 %768 }
 0x1d1   : > { %924 = vrot.lane.b32.xlu0 %v2431_v56, %s2134_s14 }
 0x1d2   : > { %615 = vrot.lane.b32.xlu1 %v2454_v61, %s2133_s7 }
 0x1d4   : > { %623 = vrot.lane.b32.xlu2 %v2461_v4, %s2133_s7 }
 0x1d6   : > { %v723_v16 = vpop.permute.xlu2 %722 }
 0x1d9   : > { %621 = vrot.lane.b32.xlu0 %v2421_v12, %s2133_s7  ;;  %s1564_s7 = sshll.u32 %s1561_s20, 4  ;;  %s1565_s7 = int_to_ptr.hbm [resolvable:$true] %s1564_s7 }
 0x1da   : > { %910 = vrot.lane.b32.xlu1 %v2418_v8, %s2134_s14 }
 0x1db   : > { %v763_v17 = vpop.permute.xlu0 %762 }
 0x1dc   : > { %v771_v20 = vpop.permute.xlu1 %770  ;;  %918 = vrot.lane.b32.xlu2 %v2421_v12, %s2134_s14 }
 0x1dd   : > { %v777_v21 = vsel %vm774_vm12, %v763_v17, %v771_v20  ;;  %v781_v22 = vsel %vm774_vm12, %v771_v20, %v763_v17 }
 0x1de   : > { %v794_v62 = vmul.f32 %v786_v18, %v781_v22  ;;  %v795_v23 = vmul.f32 %v787_v57, %v777_v21  ;;  %v2525_v24 = vpop.permute.xlu2 %712 }
 0x1e0   : > { %v800_v5 = vpack.c.bf16 %v795_v23, %v794_v62 }
 0x1e1   : > { %912 = vrot.lane.b32.xlu0 %v2454_v61, %s2134_s14 }
 0x1e2   : > { %804 = vst [vmem:[#allocation2 + $0x70] sm:$0xff] %v800_v5  ;;  %920 = vrot.lane.b32.xlu1 %v2461_v4, %s2134_s14  ;;  %s2072_s14 = sshra.s32 %s1565_s7, 4  ;;  %s2073_s14 = int_to_ptr.hbm [resolvable:$true] %s2072_s14 }
 0x1e3   : > { %v773_v27 = vpop.permute.xlu0 %772  ;;  %s2074_s15 = scalar_lea.hbm %s2073_s14, 128  ;;  %p2079_p0 = scmp.lt.s32.totalorder %s2073_s14, %s3039_s6 }
 0x1e4   : > { %v761_v28 = vpop.permute.xlu1 %760  ;;  %v778_v1 = vsel %vm774_vm12, %v765_v54, %v773_v27  ;;  %v782_v29 = vsel %vm774_vm12, %v773_v27, %v765_v54  ;;  %868 = vrot.lane.b32.xlu2 %v2428_v19, %s2135_s16  ;;  %p2075_p6 = scmp.ne.s32.totalorder %s2073_s14, %s2074_s15  ;;  %p2080_p1 = scmp.lt.s32.totalorder %s2078_s28, %s2074_s15 }
 0x1e5   : > { %v776_v30 = vsel %vm774_vm12, %v761_v28, %v769_v10  ;;  %v780_v31 = vsel %vm774_vm12, %v769_v10, %v761_v28  ;;  %v796_v13 = vmul.f32 %v786_v18, %v782_v29  ;;  %v797_v14 = vmul.f32 %v787_v57, %v778_v1 }
 0x1e6   : > { %v792_v32 = vmul.f32 %v786_v18, %v780_v31  ;;  %v793_v33 = vmul.f32 %v787_v57, %v776_v30  ;;  %v2542_v38 = vpop.permute.xlu2 %666  ;;  %p2076_p9 = pnand %p2075_p6, %p2223_p11  ;;  %p2081_p3 = por %p2080_p1, %p2079_p0 }
 0x1e7   : > { %v801_v34 = vpack.c.bf16 %v797_v14, %v796_v13 }
 0x1e8   : > { %v799_v37 = vpack.c.bf16 %v793_v33, %v792_v32  ;;  %v1661_v33 = vld [vmem:[%s3038_s5 + $0x10] sm:$0x3]  ;;  %p2077_p13 = pneg %p2076_p9 }
 0x1e9   : > { %805 = vst [vmem:[#allocation2 + $0x78] sm:$0xff] %v801_v34  ;;  %866 = vrot.lane.b32.xlu0 %v2442_v46, %s2135_s16  ;;  %v1768_v55 = vld [vmem:[#allocation2 + $0x70] sm:$0xf] }
 0x1ea   : > { %803 = vst [vmem:[#allocation2 + $0x68] sm:$0xff] %v799_v37  ;;  %874 = vrot.lane.b32.xlu1 %v2445_v35, %s2135_s16  ;;  %v2631_v37 = vperm.slane %v1661_v33, 1  ;;  %p2082_p4 = pnand %p2081_p3, %p2077_p13 }
 0x1eb   : > { %v767_v43 = vpop.permute.xlu0 %766 }
 0x1ec   : > { %v715_v44 = vpop.permute.xlu1 %714  ;;  %v775_v45 = vsel %vm774_vm12, %v759_v9, %v767_v43  ;;  %v779_v47 = vsel %vm774_vm12, %v767_v43, %v759_v9  ;;  %862 = vrot.lane.b32.xlu2 %v2418_v8, %s2135_s16 }
 0x1ed   : > { %v729_v48 = vsel %vm726_vm13, %v715_v44, %v723_v16  ;;  %v733_v26 = vsel %vm726_vm13, %v723_v16, %v715_v44  ;;  %v790_v49 = vmul.f32 %v786_v18, %v779_v47  ;;  %v791_v51 = vmul.f32 %v787_v57, %v775_v45 }
 0x1ee   : > { %v746_v52 = vmul.f32 %v2549_v39, %v733_v26  ;;  %v747_v0 = vmul.f32 %v2551_v41, %v729_v48  ;;  %v677_v40 = vpop.permute.xlu2 %676 }
 0x1ef   : > { %v798_v53 = vpack.c.bf16 %v791_v51, %v790_v49 }
 0x1f0   : > { %v752_v25 = vpack.c.bf16 %v747_v0, %v746_v52  ;;  %v1895_v42 = vld [vmem:[#allocation2 + $0x74] sm:$0xf0] }
 0x1f1   : > { %802 = vst [vmem:[#allocation2 + $0x60] sm:$0xff] %v798_v53  ;;  %876 = vrot.lane.b32.xlu0 %v2431_v56, %s2135_s16  ;;  %v1769_v58 = vor.u32 %v1895_v42, %v1768_v55  ;;  %v1893_v10 = vld [vmem:[#allocation2 + $0x64] sm:$0xf0]  ;;  %v1061_v55 = vld [vmem:[%s3037_s4 + $0x18] sm:$0xff] }
 0x1f2   : > { %756 = vst [vmem:[#allocation2 + $0x50] sm:$0xff] %v752_v25  ;;  %864 = vrot.lane.b32.xlu1 %v2454_v61, %s2135_s16 }
 0x1f3   : > { %v717_v59 = vpop.permute.xlu0 %716  ;;  %1359 = vmatpush.bf16.msra.mxu0 %v1769_v58  ;;  %1917 = vmatpush.bf16.msra.mxu1 %v1769_v58 }
 0x1f4   : > { %v725_v60 = vpop.permute.xlu1 %724  ;;  %872 = vrot.lane.b32.xlu2 %v2461_v4, %s2135_s16 }
 0x1f5   : > { %v730_v6 = vsel %vm726_vm13, %v717_v59, %v725_v60  ;;  %v734_v63 = vsel %vm726_vm13, %v725_v60, %v717_v59 }
 0x1f6   : > { %v748_v2 = vmul.f32 %v2549_v39, %v734_v63  ;;  %v749_v3 = vmul.f32 %v2551_v41, %v730_v6  ;;  %v971_v54 = vpop.permute.xlu2 %970  ;;  %v1060_v63 = vld [vmem:[%s3037_s4 + $0x10] sm:$0xff] }
 0x1f8   : > { %v753_v50 = vpack.c.bf16 %v749_v3, %v748_v2  ;;  %v1760_v9 = vld [vmem:[#allocation2 + $0x60] sm:$0xf] }
 0x1f9   : > { %870 = vrot.lane.b32.xlu0 %v2421_v12, %s2135_s16  ;;  %v1761_v7 = vor.u32 %v1893_v10, %v1760_v9  ;;  %v1752_v62 = vld [vmem:[#allocation2 + $0x50] sm:$0xf]  ;;  %v1062_v2 = vld [vmem:[%s3037_s4 + $0x20] sm:$0xff] }
 0x1fa   : > { %757 = vst [vmem:[#allocation2 + $0x58] sm:$0xff] %v753_v50  ;;  %818 = vrot.lane.b32.xlu1 %v2442_v46, %s2136_s12  ;;  %v1655_v46 = vld [vmem:[%s3038_s5 + $0x2] sm:$0x3]  ;;  %v1064_v10 = vld [vmem:[%s3037_s4 + $0x30] sm:$0xff] }
 0x1fb   : > { %v711_v11 = vpop.permute.xlu0 %710  ;;  %1360 = vmatpush.bf16.msra.mxu0 %v1761_v7  ;;  %1918 = vmatpush.bf16.msra.mxu1 %v1761_v7  ;;  %v2601_v5 = vperm.slane %v1655_v46, 1 }
 0x1fc   : > { %v719_v16 = vpop.permute.xlu1 %718  ;;  %826 = vrot.lane.b32.xlu2 %v2445_v35, %s2136_s12  ;;  %v2599_v35 = vperm.slane %v1655_v46, 0  ;;  %v1063_v46 = vld [vmem:[%s3037_s4 + $0x28] sm:$0xff] }
 0x1fd   : > { %v727_v18 = vsel %vm726_vm13, %v711_v11, %v719_v16  ;;  %v731_v57 = vsel %vm726_vm13, %v719_v16, %v711_v11 }
 0x1fe   : > { %v742_v17 = vmul.f32 %v2549_v39, %v731_v57  ;;  %v743_v20 = vmul.f32 %v2551_v41, %v727_v18  ;;  %v2592_v22 = vpop.permute.xlu2 %664 }
 0x200   : > { %v750_v21 = vpack.c.bf16 %v743_v20, %v742_v17 }
 0x201   : > { %820 = vrot.lane.b32.xlu0 %v2428_v19, %s2136_s12  ;;  %v1891_v23 = vld [vmem:[#allocation2 + $0x54] sm:$0xf0] }
 0x202   : > { %754 = vst [vmem:[#allocation2 + $0x40] sm:$0xff] %v750_v21  ;;  %828 = vrot.lane.b32.xlu1 %v2431_v56, %s2136_s12  ;;  %v1753_v27 = vor.u32 %v1891_v23, %v1752_v62  ;;  %v1065_v21 = vld [vmem:[%s3037_s4 + $0x38] sm:$0xff] }
 0x203   : > { %v721_v28 = vpop.permute.xlu0 %720 }
 0x204   : > { %v669_v1 = vpop.permute.xlu1 %668  ;;  %v728_v29 = vsel %vm726_vm13, %v2525_v24, %v721_v28  ;;  %v732_v19 = vsel %vm726_vm13, %v721_v28, %v2525_v24  ;;  %1361 = vmatpush.bf16.msra.mxu0 %v1753_v27  ;;  %1919 = vmatpush.bf16.msra.mxu1 %v1753_v27 }
 0x205   : > { %v682_v56 = vsel %vm678_vm14, %v669_v1, %v677_v40  ;;  %v686_v30 = vsel %vm678_vm14, %v677_v40, %v669_v1  ;;  %v744_v31 = vmul.f32 %v2549_v39, %v732_v19  ;;  %v745_v13 = vmul.f32 %v2551_v41, %v728_v29  ;;  %816 = vrot.lane.b32.xlu2 %v2454_v61, %s2136_s12  ;;  %v1058_v39 = vld [vmem:[%s3037_s4] sm:$0xff] }
 0x206   : > { %v700_v14 = vmul.f32 %v2599_v35, %v686_v30  ;;  %v701_v32 = vmul.f32 %v2601_v5, %v682_v56  ;;  %v2622_v36 = vpop.permute.xlu2 %958  ;;  %v2629_v61 = vperm.slane %v1661_v33, 0 }
 0x207   : > { %v751_v24 = vpack.c.bf16 %v745_v13, %v744_v31 }
 0x208   : > { %v705_v34 = vpack.c.bf16 %v701_v32, %v700_v14 }
 0x209   : > { %755 = vst [vmem:[#allocation2 + $0x48] sm:$0xff] %v751_v24  ;;  %814 = vrot.lane.b32.xlu0 %v2418_v8, %s2136_s12  ;;  %v1744_v0 = vld [vmem:[#allocation2 + $0x40] sm:$0xf] }
 0x20a   : > { %709 = vst [vmem:[#allocation2 + $0x38] sm:$0xff] %v705_v34  ;;  %822 = vrot.lane.b32.xlu1 %v2421_v12, %s2136_s12 }
 0x20b   : > { %v675_v41 = vpop.permute.xlu0 %674 }
 0x20c   : > { %v963_v43 = vpop.permute.xlu1 %962  ;;  %v681_v8 = vsel %vm678_vm14, %v2542_v38, %v675_v41  ;;  %v685_v12 = vsel %vm678_vm14, %v675_v41, %v2542_v38  ;;  %v1059_v38 = vld [vmem:[%s3037_s4 + $0x8] sm:$0xff] }
 0x20d   : > { %v977_v44 = vsel %vm974_vm15, %v963_v43, %v971_v54  ;;  %v981_v45 = vsel %vm974_vm15, %v971_v54, %v963_v43  ;;  %v698_v47 = vmul.f32 %v2599_v35, %v685_v12  ;;  %v699_v48 = vmul.f32 %v2601_v5, %v681_v8  ;;  %1068 = vperm.xlu2 %1985, %v1058_v39  }
 0x20e   : > { %v994_v26 = vmul.f32 %v2629_v61, %v977_v44  ;;  %v995_v49 = vmul.f32 %v2631_v37, %v981_v45  ;;  %v969_v40 = vpop.permute.xlu2 %968 }
 0x20f   : > { %v704_v51 = vpack.c.bf16 %v699_v48, %v698_v47 }
 0x210   : > { %v1000_v52 = vpack.c.bf16 %v995_v49, %v994_v26  ;;  %v1889_v53 = vld [vmem:[#allocation2 + $0x44] sm:$0xf0] }
 0x211   : > { %708 = vst [vmem:[#allocation2 + $0x30] sm:$0xff] %v704_v51  ;;  %824 = vrot.lane.b32.xlu0 %v2461_v4, %s2136_s12  ;;  %v1745_v25 = vor.u32 %v1889_v53, %v1744_v0  ;;  %v1887_v54 = vld [vmem:[#allocation2 + $0x34] sm:$0xf0]  ;;  %s2972_s12 = scalar_lea.vmem [#allocation6], %s1646_s29 }
 0x212   : > { %1004 = vst [vmem:[#allocation2 + $0x110] sm:$0xff] %v1000_v52  ;;  %1073 = vperm.xlu1 %1987, %v1059_v38   ;;  %s1562_s13 = sshll.u32 %s2972_s12, 4  ;;  %s1563_s13 = int_to_ptr.vmem [resolvable:$true] %s1562_s13 }
 0x213   : > { %v965_v42 = vpop.permute.xlu0 %964  ;;  %1362 = vmatpush.bf16.msra.mxu0 %v1745_v25  ;;  %1920 = vmatpush.bf16.msra.mxu1 %v1745_v25 }
 0x214   : > { %v973_v58 = vpop.permute.xlu1 %972 }
 0x215   : > { %v978_v59 = vsel %vm974_vm15, %v965_v42, %v973_v58  ;;  %v982_v60 = vsel %vm974_vm15, %v973_v58, %v965_v42  ;;  %1083 = vperm.xlu2 %1985, %v1061_v55   ;;  %v1770_v58 = vld [vmem:[#allocation2 + $0x78] sm:$0xf0] }
 0x216   : > { %v996_v4 = vmul.f32 %v2629_v61, %v978_v59  ;;  %v997_v6 = vmul.f32 %v2631_v37, %v982_v60  ;;  %v626_v11 = vpop.permute.xlu2 %625  ;;  %v1660_v59 = vld [vmem:[%s3038_s5 + $0xe] sm:$0x3]  ;;  %v1696_v60 = vld [vmem:[%s3036_s3 + $0x38] sm:$0xf] }
 0x218   : > { %v1001_v3 = vpack.c.bf16 %v997_v6, %v996_v4  ;;  %v1736_v50 = vld [vmem:[#allocation2 + $0x30] sm:$0xf]  ;;  %v1876_v4 = vld [vmem:[%s3036_s3 + $0x40] sm:$0xf0] }
 0x219   : > { %1078 = vperm.xlu0 %1986, %v1060_v63   ;;  %v1737_v9 = vor.u32 %v1887_v54, %v1736_v50  ;;  %v1848_v23 = vld [vmem:[#allocation2 + $0x110] sm:$0xf] }
 0x21a   : > { %1005 = vst [vmem:[#allocation2 + $0x118] sm:$0xff] %v1001_v3  ;;  %1088 = vperm.xlu1 %1987, %v1062_v2   ;;  %v1894_v3 = vld [vmem:[#allocation2 + $0x74] sm:$0xf] }
 0x21b   : > { %v663_v7 = vpop.permute.xlu0 %662  ;;  %1363 = vmatpush.bf16.msra.mxu0 %v1737_v9  ;;  %1921 = vmatpush.bf16.msra.mxu1 %v1737_v9  ;;  %v1773_v54 = vor.u32 %v1894_v3, %v1770_v58 }
 0x21c   : > { %v671_v16 = vpop.permute.xlu1 %670 }
 0x21d   : > { %v679_v18 = vsel %vm678_vm14, %v663_v7, %v671_v16  ;;  %v683_v57 = vsel %vm678_vm14, %v671_v16, %v663_v7  ;;  %1098 = vperm.xlu2 %1985, %v1064_v10   ;;  %v2741_v10 = vperm.slane %v1660_v59, 0  ;;  %v2743_v7 = vperm.slane %v1660_v59, 1 }
 0x21e   : > { %v694_v17 = vmul.f32 %v2599_v35, %v683_v57  ;;  %v695_v20 = vmul.f32 %v2601_v5, %v679_v18  ;;  %v2697_v32 = vpop.permute.xlu2 %916  ;;  %v1892_v18 = vld [vmem:[#allocation2 + $0x64] sm:$0xf] }
 0x220   : > { %v702_v62 = vpack.c.bf16 %v695_v20, %v694_v17 }
 0x221   : > { %1093 = vperm.xlu0 %1986, %v1063_v46   ;;  %v1915_v27 = vld [vmem:[#allocation2 + $0x114] sm:$0xf0]  ;;  %v1762_v46 = vld [vmem:[#allocation2 + $0x68] sm:$0xf0] }
 0x222   : > { %706 = vst [vmem:[#allocation2 + $0x20] sm:$0xff] %v702_v62  ;;  %1103 = vperm.xlu1 %1987, %v1065_v21   ;;  %v1849_v28 = vor.u32 %v1915_v27, %v1848_v23  ;;  %v1765_v23 = vor.u32 %v1892_v18, %v1762_v46 }
 0x223   : > { %v673_v1 = vpop.permute.xlu0 %672 }
 0x224   : > { %v961_v29 = vpop.permute.xlu1 %960  ;;  %v680_v19 = vsel %vm678_vm14, %v2592_v22, %v673_v1  ;;  %v684_v56 = vsel %vm678_vm14, %v673_v1, %v2592_v22  ;;  %1423 = vmatpush.bf16.msra.mxu2 %v1849_v28  ;;  %1925 = vmatpush.bf16.msra.mxu3 %v1849_v28  ;;  %v640_v22 = vld [vmem:[%s3038_s5] sm:$0x3]  ;;  %v1754_v28 = vld [vmem:[#allocation2 + $0x58] sm:$0xf0] }
 0x225   : > { %v976_v30 = vsel %vm974_vm15, %v961_v29, %v969_v40  ;;  %v980_v31 = vsel %vm974_vm15, %v969_v40, %v961_v29  ;;  %v696_v13 = vmul.f32 %v2599_v35, %v684_v56  ;;  %v697_v14 = vmul.f32 %v2601_v5, %v680_v19  ;;  %v1890_v56 = vld [vmem:[#allocation2 + $0x54] sm:$0xf] }
 0x226   : > { %v992_v24 = vmul.f32 %v2629_v61, %v976_v30  ;;  %v993_v33 = vmul.f32 %v2631_v37, %v980_v31  ;;  %v2705_v41 = vperm.slane %v640_v22, 0  ;;  %v2707_v35 = vperm.slane %v640_v22, 1  ;;  %v2723_v38 = vpop.permute.xlu2 %613 }
 0x227   : > { %v703_v34 = vpack.c.bf16 %v697_v14, %v696_v13  ;;  %v1757_v31 = vor.u32 %v1890_v56, %v1754_v28  ;;  %v1688_v28 = vld [vmem:[%s3036_s3 + $0x30] sm:$0xf] }
 0x228   : > { %v999_v39 = vpack.c.bf16 %v993_v33, %v992_v24 }
 0x229   : > { %707 = vst [vmem:[#allocation2 + $0x28] sm:$0xff] %v703_v34  ;;  %v1728_v0 = vld [vmem:[#allocation2 + $0x20] sm:$0xf]  ;;  %v1746_v34 = vld [vmem:[#allocation2 + $0x48] sm:$0xf0] }
 0x22a   : > { %1003 = vst [vmem:[#allocation2 + $0x108] sm:$0xff] %v999_v39 }
 0x22b   : > { %v967_v5 = vpop.permute.xlu0 %966 }
 0x22c   : > { %v618_v43 = vpop.permute.xlu1 %617  ;;  %v975_v8 = vsel %vm974_vm15, %v2622_v36, %v967_v5  ;;  %v979_v12 = vsel %vm974_vm15, %v967_v5, %v2622_v36 }
 0x22d   : > { %v634_v44 = vsel %vm631_vm0, %v618_v43, %v626_v11  ;;  %v638_v45 = vsel %vm631_vm0, %v626_v11, %v618_v43  ;;  %v990_v47 = vmul.f32 %v2629_v61, %v975_v8  ;;  %v991_v48 = vmul.f32 %v2631_v37, %v979_v12 }
 0x22e   : > { %v650_v26 = vmul.f32 %v2705_v41, %v638_v45  ;;  %v651_v49 = vmul.f32 %v2707_v35, %v634_v44  ;;  %v624_v9 = vpop.permute.xlu2 %623  ;;  %v2745_v11 = vor.u32 %v1876_v4, %v1696_v60  ;;  %v1888_v44 = vld [vmem:[#allocation2 + $0x44] sm:$0xf] }
 0x22f   : > { %v998_v51 = vpack.c.bf16 %v991_v48, %v990_v47  ;;  %v1749_v45 = vor.u32 %v1888_v44, %v1746_v34  ;;  %v1708_v47 = vld [vmem:[%s3036_s3 + $0x50] sm:$0xf]  ;;  %v1879_v48 = vld [vmem:[%s3036_s3 + $0x58] sm:$0xf0]  ;;  %v1672_v34 = vld [vmem:[%s3036_s3 + $0x8] sm:$0xf] }
 0x230   : > { %v656_v52 = vpack.c.bf16 %v651_v49, %v650_v26  ;;  %v1885_v36 = vld [vmem:[#allocation2 + $0x24] sm:$0xf0]  ;;  %v1886_v49 = vld [vmem:[#allocation2 + $0x34] sm:$0xf] }
 0x231   : > { %1002 = vst [vmem:[#allocation2 + $0x100] sm:$0xff] %v998_v51  ;;  %v1729_v53 = vor.u32 %v1885_v36, %v1728_v0  ;;  %v1913_v2 = vld [vmem:[#allocation2 + $0x104] sm:$0xf0]  ;;  %v1738_v51 = vld [vmem:[#allocation2 + $0x38] sm:$0xf0] }
 0x232   : > { %660 = vst [vmem:[#allocation2 + $0x10] sm:$0xff] %v656_v52  ;;  %v2775_v52 = vor.u32 %v1879_v48, %v1708_v47  ;;  %v1741_v36 = vor.u32 %v1886_v49, %v1738_v51 }
 0x233   : > { %v620_v25 = vpop.permute.xlu0 %619  ;;  %1364 = vmatpush.bf16.msra.mxu0 %v1729_v53  ;;  %1922 = vmatpush.bf16.msra.mxu1 %v1729_v53 }
 0x234   : > { %v628_v40 = vpop.permute.xlu1 %627 }
 0x235   : > { %v635_v61 = vsel %vm631_vm0, %v620_v25, %v628_v40  ;;  %v639_v37 = vsel %vm631_vm0, %v628_v40, %v620_v25 }
 0x236   : > { %v652_v55 = vmul.f32 %v2705_v41, %v639_v37  ;;  %v653_v42 = vmul.f32 %v2707_v35, %v635_v61  ;;  %v919_v13 = vpop.permute.xlu2 %918  ;;  %v1730_v61 = vld [vmem:[#allocation2 + $0x28] sm:$0xf0] }
 0x238   : > { %v657_v6 = vpack.c.bf16 %v653_v42, %v652_v55  ;;  %v1840_v63 = vld [vmem:[#allocation2 + $0x100] sm:$0xf]  ;;  %v1912_v48 = vld [vmem:[#allocation2 + $0x104] sm:$0xf] }
 0x239   : > { %v1841_v50 = vor.u32 %v1913_v2, %v1840_v63  ;;  %v1720_v1 = vld [vmem:[#allocation2 + $0x10] sm:$0xf] }
 0x23a   : > { %661 = vst [vmem:[#allocation2 + $0x18] sm:$0xff] %v657_v6 }
 0x23b   : > { %v915_v16 = vpop.permute.xlu0 %914  ;;  %1424 = vmatpush.bf16.msra.mxu2 %v1841_v50  ;;  %1926 = vmatpush.bf16.msra.mxu3 %v1841_v50 }
 0x23c   : > { %v923_v57 = vpop.permute.xlu1 %922 }
 0x23d   : > { %v929_v17 = vsel %vm926_vm1, %v915_v16, %v923_v57  ;;  %v933_v20 = vsel %vm926_vm1, %v923_v57, %v915_v16 }
 0x23e   : > { %v946_v21 = vmul.f32 %v2741_v10, %v929_v17  ;;  %v947_v62 = vmul.f32 %v2743_v7, %v933_v20  ;;  %1856 = vmatmul.msk.bf16.vlgmr.msra.gmra.mxu3 %vm1346_vm2, %v2745_v11  ;;  %v2789_v59 = vpop.permute.xlu2 %868  ;;  %v1659_v20 = vld [vmem:[%s3038_s5 + $0xc] sm:$0x3] }
 0x23f   : > { %1446 = vmatpush.bf16.msrb.mxu3 %v1773_v54 }
 0x240   : > { %v952_v27 = vpack.c.bf16 %v947_v62, %v946_v21  ;;  %v1850_v62 = vld [vmem:[#allocation2 + $0x118] sm:$0xf0] }
 0x241   : > { %v1883_v29 = vld [vmem:[#allocation2 + $0x14] sm:$0xf0]  ;;  %v1722_v54 = vld [vmem:[#allocation2 + $0x18] sm:$0xf0] }
 0x242   : > { %956 = vst [vmem:[#allocation2 + $0xf0] sm:$0xff] %v952_v27  ;;  %v1721_v19 = vor.u32 %v1883_v29, %v1720_v1  ;;  %v1869_v27 = vld [vmem:[%s3036_s3 + $0x8] sm:$0xf0] }
 0x243   : > { %1447 = vmatpush.bf16.msrb.mxu3 %v1765_v23  ;;  %v925_v30 = vpop.permute.xlu0 %924  ;;  %v1664_v23 = vld [vmem:[%s3036_s3] sm:$0xf] }
 0x244   : > { %v616_v14 = vpop.permute.xlu1 %615  ;;  %v930_v24 = vsel %vm926_vm1, %v2697_v32, %v925_v30  ;;  %v934_v33 = vsel %vm926_vm1, %v925_v30, %v2697_v32  ;;  %1365 = vmatpush.bf16.msra.mxu0 %v1721_v19  ;;  %1923 = vmatpush.bf16.msra.mxu1 %v1721_v19 }
 0x245   : > { %v633_v22 = vsel %vm631_vm0, %v616_v14, %v624_v9  ;;  %v637_v39 = vsel %vm631_vm0, %v624_v9, %v616_v14  ;;  %v948_v5 = vmul.f32 %v2741_v10, %v930_v24  ;;  %v949_v43 = vmul.f32 %v2743_v7, %v934_v33 }
 0x246   : > { %v648_v8 = vmul.f32 %v2705_v41, %v637_v39  ;;  %v649_v12 = vmul.f32 %v2707_v35, %v633_v22  ;;  %v2824_v22 = vperm.slane %v1659_v20, 1 }
 0x247   : > { %1448 = vmatpush.bf16.msrb.mxu3 %v1757_v31  ;;  %v953_v32 = vpack.c.bf16 %v949_v43, %v948_v5  ;;  %v1914_v5 = vld [vmem:[#allocation2 + $0x114] sm:$0xf]  ;;  %v1665_v43 = vor.u32 %v1869_v27, %v1664_v23  ;;  %v1684_v27 = vld [vmem:[%s3036_s3 + $0x20] sm:$0xf] }
 0x248   : > { %v655_v26 = vpack.c.bf16 %v649_v12, %v648_v8  ;;  %v1870_v12 = vld [vmem:[%s3036_s3 + $0x10] sm:$0xf0] }
 0x249   : > { %957 = vst [vmem:[#allocation2 + $0xf8] sm:$0xff] %v953_v32  ;;  %v1910_v3 = vld [vmem:[#allocation2 + $0xf4] sm:$0xf]  ;;  %v1832_v33 = vld [vmem:[#allocation2 + $0xf0] sm:$0xf]  ;;  %v1853_v32 = vor.u32 %v1914_v5, %v1850_v62 }
 0x24a   : > { %659 = vst [vmem:[#allocation2 + $0x8] sm:$0xff] %v655_v26 }
 0x24b   : > { %1449 = vmatpush.bf16.msrb.mxu3 %v1749_v45  ;;  %v622_v0 = vpop.permute.xlu0 %621  ;;  %v2831_v45 = vor.u32 %v1870_v12, %v1672_v34 }
 0x24c   : > { %v911_v53 = vpop.permute.xlu1 %910  ;;  %v632_v25 = vsel %vm631_vm0, %v2723_v38, %v622_v0  ;;  %v636_v40 = vsel %vm631_vm0, %v622_v0, %v2723_v38  ;;  %v1884_v38 = vld [vmem:[#allocation2 + $0x24] sm:$0xf] }
 0x24d   : > { %v927_v37 = vsel %vm926_vm1, %v911_v53, %v919_v13  ;;  %v931_v55 = vsel %vm926_vm1, %v919_v13, %v911_v53  ;;  %v646_v42 = vmul.f32 %v2705_v41, %v636_v40  ;;  %v647_v58 = vmul.f32 %v2707_v35, %v632_v25  ;;  %v1882_v35 = vld [vmem:[#allocation2 + $0x14] sm:$0xf]  ;;  %1854 = vmatmul.msk.bf16.vlgmr.msra.gmra.mxu2 %vm1346_vm2, %v2831_v45 }
 0x24e   : > { %v942_v60 = vmul.f32 %v2741_v10, %v927_v37  ;;  %v943_v4 = vmul.f32 %v2743_v7, %v931_v55  ;;  %1857 = vmatmul.msk.bf16.gmra.mxu3 %vm1346_vm2, %v2775_v52  ;;  %v1733_v63 = vor.u32 %v1884_v38, %v1730_v61  ;;  %v1725_v16 = vor.u32 %v1882_v35, %v1722_v54 }
 0x24f   : > { %1450 = vmatpush.bf16.msrb.mxu3 %v1741_v36  ;;  %v654_v6 = vpack.c.bf16 %v647_v58, %v646_v42  ;;  %v2819_v13 = vperm.slane %v1659_v20, 0  ;;  %v1842_v36 = vld [vmem:[#allocation2 + $0x108] sm:$0xf0] }
 0x250   : > { %v950_v2 = vpack.c.bf16 %v943_v4, %v942_v60  ;;  %v1834_v50 = vld [vmem:[#allocation2 + $0xf8] sm:$0xf0]  ;;  %v1911_v29 = vld [vmem:[#allocation2 + $0xf4] sm:$0xf0]  ;;  %v1845_v53 = vor.u32 %v1912_v48, %v1842_v36 }
 0x251   : > { %658 = vst [vmem:[#allocation2] sm:$0xff] %v654_v6  ;;  %v1837_v41 = vor.u32 %v1910_v3, %v1834_v50  ;;  %v1881_v1 = vld [vmem:[#allocation2 + $0x4] sm:$0xf0]  ;;  %v1714_v31 = vld [vmem:[#allocation2 + $0x8] sm:$0xf0]  ;;  %v1833_v39 = vor.u32 %v1911_v29, %v1832_v33 }
 0x252   : > { %954 = vst [vmem:[#allocation2 + $0xe0] sm:$0xff] %v950_v2 }
 0x253   : > { %1451 = vmatpush.bf16.msrb.mxu3 %v1733_v63  ;;  %v913_v9 = vpop.permute.xlu0 %912  ;;  %1475 = vmatpush.bf16.msrb.mxu2 %v1837_v41 }
 0x254   : > { %v921_v18 = vpop.permute.xlu1 %920 }
 0x255   : > { %v928_v57 = vsel %vm926_vm1, %v913_v9, %v921_v18  ;;  %v932_v17 = vsel %vm926_vm1, %v921_v18, %v913_v9  ;;  %v1676_v9 = vld [vmem:[%s3036_s3 + $0x18] sm:$0xf]  ;;  %v1872_v18 = vld [vmem:[%s3036_s3 + $0x20] sm:$0xf0] }
 0x256   : > { %v944_v46 = vmul.f32 %v2741_v10, %v928_v57  ;;  %v945_v21 = vmul.f32 %v2743_v7, %v932_v17  ;;  %v1875_v10 = vld [vmem:[%s3036_s3 + $0x38] sm:$0xf0]  ;;  %v2816_v7 = vpop.permute.xlu2 %862  ;;  %v1700_v57 = vld [vmem:[%s3036_s3 + $0x48] sm:$0xf]  ;;  %v1878_v17 = vld [vmem:[%s3036_s3 + $0x50] sm:$0xf0]  ;;  %v1677_v62 = vor.u32 %v1872_v18, %v1676_v9 }
 0x257   : > { %1452 = vmatpush.bf16.msrb.mxu3 %v1725_v16  ;;  %v2826_v8 = vor.u32 %v1875_v10, %v1688_v28  ;;  %v2876_v23 = vor.u32 %v1878_v17, %v1700_v57  ;;  %v1873_v28 = vld [vmem:[%s3036_s3 + $0x28] sm:$0xf0] }
 0x258   : > { %v951_v19 = vpack.c.bf16 %v945_v21, %v944_v46  ;;  %v1712_v56 = vld [vmem:[#allocation2] sm:$0xf]  ;;  %v1880_v30 = vld [vmem:[#allocation2 + $0x4] sm:$0xf]  ;;  %v2884_v29 = vor.u32 %v1873_v28, %v1684_v27 }
 0x259   : > { %v1713_v14 = vor.u32 %v1881_v1, %v1712_v56  ;;  %v1717_v24 = vor.u32 %v1880_v30, %v1714_v31  ;;  %v1824_v40 = vld [vmem:[#allocation2 + $0xe0] sm:$0xf]  ;;  %v1908_v37 = vld [vmem:[#allocation2 + $0xe4] sm:$0xf] }
 0x25a   : > { %955 = vst [vmem:[#allocation2 + $0xe8] sm:$0xff] %v951_v19 }
 0x25b   : > { %v867_v44 = vpop.permute.xlu0 %866  ;;  %1366 = vmatpush.bf16.msra.mxu0 %v1713_v14  ;;  %1924 = vmatpush.bf16.msra.mxu1 %v1713_v14 }
 0x25c   : > { %v875_v47 = vpop.permute.xlu1 %874  ;;  %1453 = vmatpush.bf16.msrb.mxu3 %v1717_v24 }
 0x25d   : > { %v881_v26 = vsel %vm878_vm3, %v867_v44, %v875_v47  ;;  %v885_v49 = vsel %vm878_vm3, %v875_v47, %v867_v44  ;;  %1855 = vmatmul.msk.bf16.gmra.mxu2 %vm1346_vm2, %v2884_v29 }
 0x25e   : > { %v898_v51 = vmul.f32 %v2819_v13, %v881_v26  ;;  %v899_v0 = vmul.f32 %v2824_v22, %v885_v49  ;;  %1367 = vmatmul.bf16.vlgmr.msra.gmra.mxu0 %v1665_v43  ;;  %1377 = vmatmul.bf16.vlgmr.msra.gmra.mxu1 %v2826_v8  ;;  %v873_v42 = vpop.permute.xlu2 %872 }
 0x25f   : > { %1388 = vmatpush.bf16.msrb.mxu1 %v1833_v39  ;;  %1510 = vmatpush.bf16.msrb.mxu0 %v1853_v32 }
 0x260   : > { %1454 = vmatmul.bf16.vlgmr.msrb.gmra.mxu3 %v1665_v43  ;;  %v904_v25 = vpack.c.bf16 %v899_v0, %v898_v51 }
 0x261   : > { %v1909_v61 = vld [vmem:[#allocation2 + $0xe4] sm:$0xf0]  ;;  %v1826_v55 = vld [vmem:[#allocation2 + $0xe8] sm:$0xf0] }
 0x262   : > { %908 = vst [vmem:[#allocation2 + $0xd0] sm:$0xff] %v904_v25  ;;  %v1825_v58 = vor.u32 %v1909_v61, %v1824_v40  ;;  %v1829_v60 = vor.u32 %v1908_v37, %v1826_v55 }
 0x263   : > { %1511 = vmatpush.bf16.msrb.mxu0 %v1845_v53  ;;  %v877_v4 = vpop.permute.xlu0 %876 }
 0x264   : > { %v865_v38 = vpop.permute.xlu1 %864  ;;  %v882_v6 = vsel %vm878_vm3, %v2789_v59, %v877_v4  ;;  %v886_v63 = vsel %vm878_vm3, %v877_v4, %v2789_v59  ;;  %1389 = vmatpush.bf16.msrb.mxu1 %v1825_v58  ;;  %1476 = vmatpush.bf16.msrb.mxu2 %v1829_v60  ;;  %v1658_v59 = vld [vmem:[%s3038_s5 + $0xa] sm:$0x3] }
 0x265   : > { %v880_v2 = vsel %vm878_vm3, %v865_v38, %v873_v42  ;;  %v884_v3 = vsel %vm878_vm3, %v873_v42, %v865_v38  ;;  %v900_v50 = vmul.f32 %v2819_v13, %v882_v6  ;;  %v901_v54 = vmul.f32 %v2824_v22, %v886_v63 }
 0x266   : > { %v896_v41 = vmul.f32 %v2819_v13, %v880_v2  ;;  %v897_v35 = vmul.f32 %v2824_v22, %v884_v3  ;;  %v2872_v46 = vperm.slane %v1658_v59, 0  ;;  %v2874_v21 = vperm.slane %v1658_v59, 1  ;;  %v827_v10 = vpop.permute.xlu2 %826 }
 0x267   : > { %v905_v16 = vpack.c.bf16 %v901_v54, %v900_v50 }
 0x268   : > { %v903_v20 = vpack.c.bf16 %v897_v35, %v896_v41 }
 0x269   : > { %909 = vst [vmem:[#allocation2 + $0xd8] sm:$0xff] %v905_v16  ;;  %v1816_v5 = vld [vmem:[#allocation2 + $0xd0] sm:$0xf]  ;;  %v1906_v44 = vld [vmem:[#allocation2 + $0xd4] sm:$0xf] }
 0x26a   : > { %907 = vst [vmem:[#allocation2 + $0xc8] sm:$0xff] %v903_v20 }
 0x26b   : > { %v871_v1 = vpop.permute.xlu0 %870 }
 0x26c   : > { %v819_v19 = vpop.permute.xlu1 %818  ;;  %v879_v56 = vsel %vm878_vm3, %v2816_v7, %v871_v1  ;;  %v883_v30 = vsel %vm878_vm3, %v871_v1, %v2816_v7  ;;  %v1784_v1 = vld [vmem:[#allocation2 + $0x90] sm:$0xf] }
 0x26d   : > { %v833_v31 = vsel %vm830_vm4, %v819_v19, %v827_v10  ;;  %v837_v14 = vsel %vm830_vm4, %v827_v10, %v819_v19  ;;  %v894_v24 = vmul.f32 %v2819_v13, %v879_v56  ;;  %v895_v33 = vmul.f32 %v2824_v22, %v883_v30  ;;  %v1898_v10 = vld [vmem:[#allocation2 + $0x94] sm:$0xf]  ;;  %v1786_v19 = vld [vmem:[#allocation2 + $0x98] sm:$0xf0]  ;;  %v1897_v30 = vld [vmem:[#allocation2 + $0x84] sm:$0xf0] }
 0x26e   : > { %v850_v34 = vmul.f32 %v2872_v46, %v833_v31  ;;  %v851_v39 = vmul.f32 %v2874_v21, %v837_v14  ;;  %1372 = vmatmul.bf16.gmra.mxu0 %v1677_v62  ;;  %1382 = vmatmul.bf16.gmra.mxu1 %v2876_v23  ;;  %v817_v59 = vpop.permute.xlu2 %816  ;;  %v1789_v56 = vor.u32 %v1898_v10, %v1786_v19  ;;  %v1778_v31 = vld [vmem:[#allocation2 + $0x88] sm:$0xf0]  ;;  %v1776_v14 = vld [vmem:[#allocation2 + $0x80] sm:$0xf] }
 0x26f   : > { %v902_v7 = vpack.c.bf16 %v895_v33, %v894_v24  ;;  %v1896_v24 = vld [vmem:[#allocation2 + $0x84] sm:$0xf]  ;;  %v1777_v33 = vor.u32 %v1897_v30, %v1776_v14 }
 0x270   : > { %1459 = vmatmul.bf16.gmra.mxu3 %v1677_v62  ;;  %v856_v43 = vpack.c.bf16 %v851_v39, %v850_v34  ;;  %v1907_v12 = vld [vmem:[#allocation2 + $0xd4] sm:$0xf0]  ;;  %v1818_v32 = vld [vmem:[#allocation2 + $0xd8] sm:$0xf0]  ;;  %v1781_v34 = vor.u32 %v1896_v24, %v1778_v31 }
 0x271   : > { %906 = vst [vmem:[#allocation2 + $0xc0] sm:$0xff] %v902_v7  ;;  %v1817_v13 = vor.u32 %v1907_v12, %v1816_v5  ;;  %v1821_v22 = vor.u32 %v1906_v44, %v1818_v32  ;;  %v1905_v36 = vld [vmem:[#allocation2 + $0xc4] sm:$0xf0]  ;;  %v1810_v61 = vld [vmem:[#allocation2 + $0xc8] sm:$0xf0] }
 0x272   : > { %860 = vst [vmem:[#allocation2 + $0xb0] sm:$0xff] %v856_v43  ;;  %v1871_v7 = vld [vmem:[%s3036_s3 + $0x1c] sm:$0xf]  ;;  %v1678_v5 = vld [vmem:[%s3036_s3 + $0x24] sm:$0xf0] }
 0x273   : > { %v821_v47 = vpop.permute.xlu0 %820  ;;  %1390 = vmatpush.bf16.msrb.mxu1 %v1817_v13  ;;  %1477 = vmatpush.bf16.msrb.mxu2 %v1821_v22  ;;  %v1681_v43 = vor.u32 %v1871_v7, %v1678_v5  ;;  %v1874_v12 = vld [vmem:[%s3036_s3 + $0x34] sm:$0xf]  ;;  %v1877_v32 = vld [vmem:[%s3036_s3 + $0x4c] sm:$0xf]  ;;  %v1702_v13 = vld [vmem:[%s3036_s3 + $0x54] sm:$0xf0] }
 0x274   : > { %v829_v48 = vpop.permute.xlu1 %828 }
 0x275   : > { %v834_v26 = vsel %vm830_vm4, %v821_v47, %v829_v48  ;;  %v838_v49 = vsel %vm830_vm4, %v829_v48, %v821_v47 }
 0x276   : > { %v852_v51 = vmul.f32 %v2872_v46, %v834_v26  ;;  %v853_v0 = vmul.f32 %v2874_v21, %v838_v49 }
 0x278   : > { %v857_v53 = vpack.c.bf16 %v853_v0, %v852_v51  ;;  %v1808_v25 = vld [vmem:[#allocation2 + $0xc0] sm:$0xf]  ;;  %v1904_v40 = vld [vmem:[#allocation2 + $0xc4] sm:$0xf] }
 0x279   : > { %v1809_v37 = vor.u32 %v1905_v36, %v1808_v25  ;;  %v1813_v55 = vor.u32 %v1904_v40, %v1810_v61  ;;  %v1800_v2 = vld [vmem:[#allocation2 + $0xb0] sm:$0xf]  ;;  %v1902_v50 = vld [vmem:[#allocation2 + $0xb4] sm:$0xf] }
 0x27a   : > { %861 = vst [vmem:[#allocation2 + $0xb8] sm:$0xff] %v857_v53 }
 0x27b   : > { %v815_v42 = vpop.permute.xlu0 %814  ;;  %1391 = vmatpush.bf16.msrb.mxu1 %v1809_v37  ;;  %1478 = vmatpush.bf16.msrb.mxu2 %v1813_v55 }
 0x27c   : > { %v823_v58 = vpop.permute.xlu1 %822 }
 0x27d   : > { %v831_v60 = vsel %vm830_vm4, %v815_v42, %v823_v58  ;;  %v835_v4 = vsel %vm830_vm4, %v823_v58, %v815_v42 }
 0x27e   : > { %v846_v38 = vmul.f32 %v2872_v46, %v831_v60  ;;  %v847_v6 = vmul.f32 %v2874_v21, %v835_v4  ;;  %1858 = vmatmul.msk.bf16.vlgmr.msrb.gmra.mxu0 %vm1346_vm2, %v2831_v45  ;;  %v1069_v4 = vpop.permute.xlu2 %1068 }
 0x280   : > { %1464 = vmatmul.bf16.gmra.mxu3 %v2826_v8  ;;  %v854_v63 = vpack.c.bf16 %v847_v6, %v846_v38 }
 0x281   : > { %v1903_v3 = vld [vmem:[#allocation2 + $0xb4] sm:$0xf0]  ;;  %v1802_v54 = vld [vmem:[#allocation2 + $0xb8] sm:$0xf0] }
 0x282   : > { %858 = vst [vmem:[#allocation2 + $0xa0] sm:$0xff] %v854_v63  ;;  %v1801_v41 = vor.u32 %v1903_v3, %v1800_v2  ;;  %v1805_v35 = vor.u32 %v1902_v50, %v1802_v54 }
 0x283   : > { %v825_v9 = vpop.permute.xlu0 %824 }
 0x284   : > { %v832_v16 = vsel %vm830_vm4, %v817_v59, %v825_v9  ;;  %v836_v18 = vsel %vm830_vm4, %v825_v9, %v817_v59  ;;  %1392 = vmatpush.bf16.msrb.mxu1 %v1801_v41  ;;  %1479 = vmatpush.bf16.msrb.mxu2 %v1805_v35  ;;  %v1074_v35 = vpop.permute.xlu1 %1073 }
 0x285   : > { %v848_v8 = vmul.f32 %v2872_v46, %v832_v16  ;;  %v849_v45 = vmul.f32 %v2874_v21, %v836_v18  ;;  %v1899_v46 = vld [vmem:[#allocation2 + $0x94] sm:$0xf0] }
 0x286   : > { %v1785_v21 = vor.u32 %v1899_v46, %v1784_v1  ;;  %v1084_v31 = vpop.permute.xlu2 %1083 }
 0x287   : > { %v855_v57 = vpack.c.bf16 %v849_v45, %v848_v8 }
 0x289   : > { %859 = vst [vmem:[#allocation2 + $0xa8] sm:$0xff] %v855_v57  ;;  %v1792_v17 = vld [vmem:[#allocation2 + $0xa0] sm:$0xf]  ;;  %v1900_v62 = vld [vmem:[#allocation2 + $0xa4] sm:$0xf] }
 0x28e   : > { %1859 = vmatmul.msk.bf16.gmra.mxu0 %vm1346_vm2, %v2884_v29  ;;  %v1666_v29 = vld [vmem:[%s3036_s3 + $0xc] sm:$0xf0] }
 0x290   : > { %1469 = vmatmul.bf16.gmra.mxu3 %v2876_v23  ;;  %v1901_v20 = vld [vmem:[#allocation2 + $0xa4] sm:$0xf0]  ;;  %v1794_v27 = vld [vmem:[#allocation2 + $0xa8] sm:$0xf0]  ;;  %v1868_v23 = vld [vmem:[%s3036_s3 + $0x4] sm:$0xf] }
 0x291   : > { %v1793_v28 = vor.u32 %v1901_v20, %v1792_v17  ;;  %v1797_v15 = vor.u32 %v1900_v62, %v1794_v27  ;;  %v1669_v39 = vor.u32 %v1868_v23, %v1666_v29  ;;  %v1079_v20 = vpop.permute.xlu0 %1078 }
 0x293   : > { %1393 = vmatpush.bf16.msrb.mxu1 %v1793_v28  ;;  %1480 = vmatpush.bf16.msrb.mxu2 %v1797_v15 }
 0x297   : > { %1394 = vmatpush.bf16.msrb.mxu1 %v1785_v21  ;;  %1481 = vmatpush.bf16.msrb.mxu2 %v1789_v56 }
 0x29b   : > { %1395 = vmatpush.bf16.msrb.mxu1 %v1777_v33  ;;  %1482 = vmatpush.bf16.msrb.mxu2 %v1781_v34 }
 0x29e   : > { %1396 = vmatmul.bf16.vlgmr.msrb.gmra.mxu1 %v1669_v39  ;;  %1483 = vmatmul.bf16.vlgmr.msrb.gmra.mxu2 %v1669_v39 }
 0x29f   : > { %1860 = vmatmul.msk.bf16.gmra.mxu0 %vm1346_vm2, %v2745_v11  ;;  %v1690_v11 = vld [vmem:[%s3036_s3 + $0x3c] sm:$0xf0] }
 0x2a0   : > { %v1693_v44 = vor.u32 %v1874_v12, %v1690_v11  ;;  %v1089_v12 = vpop.permute.xlu1 %1088 }
 0x2ae   : > { %1401 = vmatmul.bf16.gmra.mxu1 %v1681_v43  ;;  %1488 = vmatmul.bf16.gmra.mxu2 %v1681_v43 }
 0x2af   : > { %1861 = vmatmul.msk.bf16.gmra.mxu0 %vm1346_vm2, %v2775_v52  ;;  %v1705_v52 = vor.u32 %v1877_v32, %v1702_v13 }
 0x2be   : > { %1406 = vmatmul.bf16.gmra.mxu1 %v1693_v44  ;;  %1493 = vmatmul.bf16.gmra.mxu2 %v1693_v44 }
 0x2c1   : > { %v2955_v22 = vpop.f32.mrf.mxu3 }
 0x2c9   : > { %v2957_v48 = vpop.f32.mrf.mxu3 }
 0x2ce   : > { %1411 = vmatmul.bf16.gmra.mxu1 %v1705_v52  ;;  %1498 = vmatmul.bf16.gmra.mxu2 %v1705_v52 }
 0x2d0   : > { %v1426_v0 = vpop.f32.mrf.mxu2 }
 0x2d1   : > { %v2961_v51 = vpop.f32.mrf.mxu3 }
 0x2d8   : > { %v1428_v40 = vpop.f32.mrf.mxu2 }
 0x2d9   : > { %v2965_v25 = vpop.f32.mrf.mxu3 }
 0x2db   : > { %v1368_v47 = vpop.f32.mrf.mxu0  ;;  %v2959_v26 = vpop.f32.mrf.mxu1 }
 0x2dc   : > { %v1369_v63 = vadd.f32 %v1368_v47, %v1069_v4  ;;  %v1379_v44 = vadd.f32 %v2959_v26, %v1089_v12 }
 0x2e0   : > { %v1431_v42 = vpop.f32.mrf.mxu2 }
 0x2e3   : > { %v1370_v49 = vpop.f32.mrf.mxu0  ;;  %v2963_v36 = vpop.f32.mrf.mxu1 }
 0x2e4   : > { %v1455_v55 = vpop.f32.mrf.mxu3  ;;  %v1371_v9 = vadd.f32 %v1370_v49, %v1074_v35 }
 0x2e5   : > { %v1456_v41 = vadd.f32 %v1455_v55, %v1069_v4 }
 0x2e8   : > { %v1433_v6 = vpop.f32.mrf.mxu2 }
 0x2eb   : > { %v1373_v53 = vpop.f32.mrf.mxu0  ;;  %v2967_v61 = vpop.f32.mrf.mxu1 }
 0x2ec   : > { %v1457_v38 = vpop.f32.mrf.mxu3  ;;  %v1374_v15 = vadd.f32 %v1373_v53, %v1079_v20  ;;  %v1094_v53 = vpop.permute.xlu0 %1093 }
 0x2ed   : > { %v1458_v62 = vadd.f32 %v1457_v38, %v1074_v35 }
 0x2f3   : > { %v1375_v37 = vpop.f32.mrf.mxu0  ;;  %v2969_v58 = vpop.f32.mrf.mxu1 }
 0x2f4   : > { %v1460_v18 = vpop.f32.mrf.mxu3  ;;  %v1376_v29 = vadd.f32 %v1375_v37, %v1084_v31 }
 0x2f5   : > { %v1461_v30 = vadd.f32 %v1460_v18, %v1079_v20 }
 0x2fb   : > { %v1513_v60 = vpop.f32.mrf.mxu0 }
 0x2fc   : > { %v1462_v21 = vpop.f32.mrf.mxu3 }
 0x2fd   : > { %v1463_v43 = vadd.f32 %v1462_v21, %v1084_v31 }
 0x303   : > { %v1515_v54 = vpop.f32.mrf.mxu0 }
 0x304   : > { %v1465_v5 = vpop.f32.mrf.mxu3 }
 0x30b   : > { %v1518_v28 = vpop.f32.mrf.mxu0 }
 0x30c   : > { %v1467_v37 = vpop.f32.mrf.mxu3 }
 0x313   : > { %v1520_v33 = vpop.f32.mrf.mxu0 }
 0x31b   : > { %v1397_v2 = vpop.f32.mrf.mxu1 }
 0x31c   : > { %v1398_v3 = vadd.f32 %v1397_v2, %v1369_v63  ;;  %v1523_v49 = vpop.f32.mrf.mxu0  ;;  %v1468_v2 = vadd.f32 %v1467_v37, %v1094_v53 }
 0x31e   : > { %v1427_v50 = vadd.f32 %v1426_v0, %v1398_v3 }
 0x320   : > { %1533 = vst [vmem:[%s2972_s12] sm:$0xff] %v1427_v50 }
 0x321   : > { %v1484_v59 = vpop.f32.mrf.mxu2 }
 0x322   : > { %v1485_v16 = vadd.f32 %v1484_v59, %v1456_v41  ;;  %v1470_v41 = vpop.f32.mrf.mxu3 }
 0x323   : > { %v1399_v8 = vpop.f32.mrf.mxu1 }
 0x324   : > { %v1514_v45 = vadd.f32 %v1513_v60, %v1485_v16  ;;  %v1400_v57 = vadd.f32 %v1399_v8, %v1371_v9  ;;  %v1525_v63 = vpop.f32.mrf.mxu0  ;;  %v1104_v16 = vpop.permute.xlu1 %1103 }
 0x326   : > { %1534 = vst [vmem:[%s2972_s12 + $0x8] sm:$0xff] %v1514_v45  ;;  %v1429_v17 = vadd.f32 %v1428_v40, %v1400_v57  ;;  %v1466_v40 = vadd.f32 %v1465_v5, %v1089_v12  ;;  %v1386_v45 = vadd.f32 %v2969_v58, %v1104_v16 }
 0x328   : > { %1535 = vst [vmem:[%s2972_s12 + $0x10] sm:$0xff] %v1429_v17 }
 0x329   : > { %v1486_v27 = vpop.f32.mrf.mxu2 }
 0x32a   : > { %v1487_v1 = vadd.f32 %v1486_v27, %v1458_v62  ;;  %v1472_v62 = vpop.f32.mrf.mxu3 }
 0x32b   : > { %v1402_v10 = vpop.f32.mrf.mxu1  ;;  %v1473_v27 = vadd.f32 %v1472_v62, %v1104_v16 }
 0x32c   : > { %v1516_v46 = vadd.f32 %v1515_v54, %v1487_v1  ;;  %v1403_v19 = vadd.f32 %v1402_v10, %v1374_v15  ;;  %v1528_v18 = vpop.f32.mrf.mxu0 }
 0x32e   : > { %1536 = vst [vmem:[%s2972_s12 + $0x18] sm:$0xff] %v1516_v46  ;;  %v1432_v56 = vadd.f32 %v1431_v42, %v1403_v19  ;;  %v1381_v42 = vadd.f32 %v2963_v36, %v1094_v53 }
 0x330   : > { %1537 = vst [vmem:[%s2972_s12 + $0x20] sm:$0xff] %v1432_v56 }
 0x331   : > { %v1489_v23 = vpop.f32.mrf.mxu2 }
 0x332   : > { %v1490_v14 = vadd.f32 %v1489_v23, %v1461_v30 }
 0x333   : > { %v1404_v24 = vpop.f32.mrf.mxu1 }
 0x334   : > { %v1519_v34 = vadd.f32 %v1518_v28, %v1490_v14  ;;  %v1405_v39 = vadd.f32 %v1404_v24, %v1376_v29  ;;  %v1530_v15 = vpop.f32.mrf.mxu0 }
 0x336   : > { %1538 = vst [vmem:[%s2972_s12 + $0x28] sm:$0xff] %v1519_v34  ;;  %v1434_v7 = vadd.f32 %v1433_v6, %v1405_v39 }
 0x338   : > { %1539 = vst [vmem:[%s2972_s12 + $0x30] sm:$0xff] %v1434_v7 }
 0x339   : > { %v1491_v11 = vpop.f32.mrf.mxu2 }
 0x33a   : > { %v1492_v32 = vadd.f32 %v1491_v11, %v1463_v43 }
 0x33b   : > { %v1407_v13 = vpop.f32.mrf.mxu1 }
 0x33c   : > { %v1521_v52 = vadd.f32 %v1520_v33, %v1492_v32  ;;  %v1408_v47 = vadd.f32 %v1407_v13, %v1379_v44 }
 0x33e   : > { %1540 = vst [vmem:[%s2972_s12 + $0x38] sm:$0xff] %v1521_v52  ;;  %v1437_v0 = vadd.f32 %v2955_v22, %v1408_v47  ;;  %v1099_v22 = vpop.permute.xlu2 %1098 }
 0x33f   : > { %v1384_v50 = vadd.f32 %v2967_v61, %v1099_v22 }
 0x340   : > { %1541 = vst [vmem:[%s2972_s12 + $0x40] sm:$0xff] %v1437_v0 }
 0x341   : > { %v1494_v55 = vpop.f32.mrf.mxu2 }
 0x342   : > { %v1495_v60 = vadd.f32 %v1494_v55, %v1466_v40 }
 0x343   : > { %v1409_v4 = vpop.f32.mrf.mxu1 }
 0x344   : > { %v1524_v26 = vadd.f32 %v1523_v49, %v1495_v60  ;;  %v1410_v38 = vadd.f32 %v1409_v4, %v1381_v42 }
 0x346   : > { %1542 = vst [vmem:[%s2972_s12 + $0x48] sm:$0xff] %v1524_v26  ;;  %v1439_v6 = vadd.f32 %v2957_v48, %v1410_v38  ;;  %v1471_v48 = vadd.f32 %v1470_v41, %v1099_v22 }
 0x348   : > { %1543 = vst [vmem:[%s2972_s12 + $0x50] sm:$0xff] %v1439_v6 }
 0x349   : > { %v1496_v3 = vpop.f32.mrf.mxu2 }
 0x34a   : > { %v1497_v54 = vadd.f32 %v1496_v3, %v1468_v2 }
 0x34b   : > { %v1412_v36 = vpop.f32.mrf.mxu1 }
 0x34c   : > { %v1526_v35 = vadd.f32 %v1525_v63, %v1497_v54  ;;  %v1413_v59 = vadd.f32 %v1412_v36, %v1384_v50 }
 0x34e   : > { %1544 = vst [vmem:[%s2972_s12 + $0x58] sm:$0xff] %v1526_v35  ;;  %v1442_v9 = vadd.f32 %v2961_v51, %v1413_v59 }
 0x350   : > { %1545 = vst [vmem:[%s2972_s12 + $0x60] sm:$0xff] %v1442_v9 }
 0x351   : > { %v1499_v8 = vpop.f32.mrf.mxu2 }
 0x352   : > { %v1500_v61 = vadd.f32 %v1499_v8, %v1471_v48 }
 0x353   : > { %v1414_v57 = vpop.f32.mrf.mxu1 }
 0x354   : > { %v1529_v17 = vadd.f32 %v1528_v18, %v1500_v61  ;;  %v1415_v20 = vadd.f32 %v1414_v57, %v1386_v45 }
 0x356   : > { %1546 = vst [vmem:[%s2972_s12 + $0x68] sm:$0xff] %v1529_v17  ;;  %v1444_v51 = vadd.f32 %v2965_v25, %v1415_v20 }
 0x358   : > { %1547 = vst [vmem:[%s2972_s12 + $0x70] sm:$0xff] %v1444_v51 }
 0x359   : > { %v1501_v58 = vpop.f32.mrf.mxu2 }
 0x35a   : > { %v1502_v28 = vadd.f32 %v1501_v58, %v1473_v27 }
 0x35c   : > { %v1531_v1 = vadd.f32 %v1530_v15, %v1502_v28 }
 0x35e   : > { %1548 = vst [vmem:[%s2972_s12 + $0x78] sm:$0xff] %v1531_v1 }
 0x35f   : > { %2085 = shalt.err (!%p2082_p4)
}
 0x360   : > { %s2137_s18 = smov 256  }
 0x361   : > { %1929 = dma.vmem_to_hbm [thread:$0]  (%p2223_p11), %s1563_s13, 2048, %s1565_s7, %s1550_s25, %s2137_s18, %s2137_s18, %s2131_s26  }
 0x362 PF: > { %s1579_s12 = sand.u32 1, %s2112_s21   ;;  %p3051_p7 = scmp.ge.s32.totalorder %s2124_s24, 2 }
 0x363   : > { %s1580_s17 = scalar_lea.sflag [#allocation5], %s1579_s12 }
 0x364   : > { %p1936_p5 = pnand %p3051_p7, %p2227_p12 }
 0x366   : > { %p1937_p8 = pneg %p1936_p5 }
 0x368   : > { %2107 = dma.done.wait (%p1937_p8), %s1580_s17, 2048  }
 0x369   : > { %2109 = vsyncadd (%p1937_p8), %s1580_s17, 4294965248  ;;  %p19_p10 = scmp.ge.s32.totalorder %s2198_s27, 4   ;;  %s3052_s21 = smov %s2116_s22 }
 0x36a   : > { %s3053_s22 = smov %s2120_s23  ;;  %s3054_s23 = smov %s2210_s30 }
 0x36b   : > { %s3055_s24 = smov %s2198_s27  ;;  %21 = sbr.rel (!%p19_p10) target bundleno = 5 (0x5), region = 96 }
 0x370   :  { %1586 = vsyncpa [#allocation4], 1 }
 0x371   :  { %1588 = vsyncpa [#allocation4 + $0x1], 1 }
 0x372   :  { %1589 = vsyncpa [#allocation5], 1 }
 0x373   :  { %1591 = vsyncpa [#allocation5 + $0x1], 1 }

</bundles_post_ra>
